<compile_context>
chip_gen: v6e
topology: v6e:2x2x1
jax: 0.10.0
libtpu: 0.0.40
codegen_flags: <defaults>
</compile_context>

<pallas_src>
import functools
import numpy as np
import jax
import jax.numpy as jnp
from jax.experimental import pallas as pl

FLOAT32_MIN = float(np.finfo(np.float32).min)  # torch.finfo().min


def _mha_kernel(*refs, H, D, inv_sqrt_kdim, has_mask):
    # refs (all whole-array VMEM blocks, single grid step):
    #   q: (B,Sq,k_dim)  k: (B,Sk,k_dim)  v: (B,Sk,v_dim)
    #   [mask: (B,Sq,1) or (B,Sq,Sk) raw 0/1-style mask]   (only if has_mask)
    #   wq/wk: (k_dim, H*D)   wv: (v_dim, H*D)   wproj: (H*D, D)
    #   o: (B,Sq,D)
    if has_mask:
        (q_ref, k_ref, v_ref, mask_ref,
         wq_ref, wk_ref, wv_ref, wproj_ref, o_ref) = refs
    else:
        (q_ref, k_ref, v_ref,
         wq_ref, wk_ref, wv_ref, wproj_ref, o_ref) = refs
        mask_ref = None

    q = q_ref[...]
    k = k_ref[...]
    v = v_ref[...]
    wq = wq_ref[...]
    wk = wk_ref[...]
    wv = wv_ref[...]
    wproj = wproj_ref[...]

    # Stacked per-head projections (bias=False) as full-lane-width MXU matmuls.
    # 1/sqrt(k_dim) folded into the (small) projected Q instead of the scores.
    qp = jnp.einsum('bsk,kd->bsd', q, wq,
                    preferred_element_type=jnp.float32) * inv_sqrt_kdim
    kp = jnp.einsum('bsk,kd->bsd', k, wk, preferred_element_type=jnp.float32)
    vp = jnp.einsum('bsv,vd->bsd', v, wv, preferred_element_type=jnp.float32)

    if has_mask:
        # additive mask = max(log(mask), FLOAT32_MIN); broadcasts over the key axis
        amask = jnp.maximum(jnp.log(mask_ref[...]), jnp.float32(FLOAT32_MIN))

    B, Sq, _ = q.shape
    acc = jnp.zeros((B, Sq, D), jnp.float32)

    # Static unroll over heads; output projection fused as an over-heads accumulation.
    for h in range(H):
        lo = h * D
        qh = qp[:, :, lo:lo + D]            # (B,Sq,D)  == query @ wq[h]
        kh = kp[:, :, lo:lo + D]            # (B,Sk,D)
        vh = vp[:, :, lo:lo + D]            # (B,Sk,D)

        s = jnp.einsum('bqd,bkd->bqk', qh, kh,
                       preferred_element_type=jnp.float32)      # (B,Sq,Sk)
        if has_mask:
            s = s + amask

        # NOTE: reference does torch.softmax(mul, 1) -> softmax over the QUERY axis
        # (axis=1 of (B,Sq,Sk)), not the usual key axis. Reproduce exactly.
        m = jnp.max(s, axis=1, keepdims=True)
        e = jnp.exp(s - m)
        denom = jnp.sum(e, axis=1, keepdims=True)
        p = e * pl.reciprocal(denom, approx=True)

        ho = jnp.einsum('bqk,bkd->bqd', p, vh,
                        preferred_element_type=jnp.float32)     # (B,Sq,D)
        # concat-then-proj == sum over heads of ho_h @ wproj[h*D:(h+1)*D, :]
        acc = acc + jnp.einsum('bqd,de->bqe', ho, wproj[lo:lo + D, :],
                               preferred_element_type=jnp.float32)

    o_ref[...] = acc


def multi_head_attention(query, key, value, params, mask=None):
    wq, wk, wv, wproj = params['wq'], params['wk'], params['wv'], params['wproj']
    H, k_dim, D = wq.shape
    v_dim = wv.shape[1]
    B, Sq, _ = query.shape

    # Stack heads on the lane axis: (H, in_dim, D) -> (in_dim, H*D); column block h
    # corresponds to head h, matching torch.cat(result, dim=-1) ordering.
    wq_s = jnp.transpose(wq, (1, 0, 2)).reshape(k_dim, H * D)
    wk_s = jnp.transpose(wk, (1, 0, 2)).reshape(k_dim, H * D)
    wv_s = jnp.transpose(wv, (1, 0, 2)).reshape(v_dim, H * D)

    has_mask = mask is not None
    args = [query, key, value]
    if has_mask:
        m = mask.astype(jnp.float32)
        if m.ndim == 2:
            # mask.unsqueeze(-1).expand(...) semantics: broadcast over keys in-kernel
            m = m[:, :, None]                    # (B,Sq,1)
        args.append(m)
    args += [wq_s, wk_s, wv_s, wproj]

    kernel = functools.partial(
        _mha_kernel, H=H, D=D,
        inv_sqrt_kdim=1.0 / float(np.sqrt(k_dim)),
        has_mask=has_mask)

    # Whole problem fits VMEM at these shapes -> single block, no grid, one launch.
    # TODO(synk): for long sequences add an Sk-tiling grid axis sized against the
    # 64 MiB v7x VMEM budget (Sk tiles are independent since softmax reduces over Sq).
    return pl.pallas_call(
        kernel,
        out_shape=jax.ShapeDtypeStruct((B, Sq, D), jnp.float32),
    )(*args)


def reference(query, key, value, params, mask=None):
    """Pure-JAX mirror of the PyTorch module, for correctness checking."""
    wq, wk, wv, wproj = params['wq'], params['wk'], params['wv'], params['wproj']
    H, k_dim, D = wq.shape
    B, Sq, _ = query.shape
    Sk = key.shape[1]
    if mask is None:
        amask = jnp.zeros((B, Sq, Sk), jnp.float32)
    else:
        m = mask.astype(jnp.float32)
        if m.ndim != 3:
            m = jnp.broadcast_to(m[..., None], (B, Sq, Sk))
        amask = jnp.maximum(jnp.log(m), jnp.float32(FLOAT32_MIN))
    outs = []
    for h in range(H):
        q = query @ wq[h]
        k = key @ wk[h]
        v = value @ wv[h]
        s = jnp.einsum('bqd,bkd->bqk', q, k) / jnp.sqrt(jnp.float32(k_dim)) + amask
        p = jax.nn.softmax(s, axis=1)          # softmax over query axis, as in torch
        outs.append(jnp.einsum('bqk,bkd->bqd', p, v))
    concat = jnp.concatenate(outs, axis=-1)
    return concat @ wproj


if __name__ == "__main__":
    B, Sq, Sk = 2, 8, 8
    k_dim, v_dim, model_dim, H = 16, 16, 32, 8

    root = jax.random.PRNGKey(0)
    ks = jax.random.split(root, 8)
    query = jax.random.normal(ks[0], (B, Sq, k_dim), jnp.float32)
    key_in = jax.random.normal(ks[1], (B, Sk, k_dim), jnp.float32)
    value = jax.random.normal(ks[2], (B, Sk, v_dim), jnp.float32)

    # deterministic synthetic parameters (nn.Linear(..., bias=False) weights,
    # stored pre-transposed so x @ W maps in_dim -> model_dim)
    params = dict(
        wq=jax.random.normal(ks[3], (H, k_dim, model_dim), jnp.float32) * 0.1,
        wk=jax.random.normal(ks[4], (H, k_dim, model_dim), jnp.float32) * 0.1,
        wv=jax.random.normal(ks[5], (H, v_dim, model_dim), jnp.float32) * 0.1,
        wproj=jax.random.normal(ks[6], (H * model_dim, model_dim), jnp.float32) * 0.1,
    )

    # boolean-style mask over query positions, (B, Sq); keep at least one live row
    # (all-masked batches would give 0/0 NaN under the query-axis softmax, same as torch)
    mask = (jax.random.uniform(ks[7], (B, Sq)) > 0.2).astype(jnp.float32)
    mask = mask.at[:, 0].set(1.0)

    out = multi_head_attention(query, key_in, value, params, mask)
    out = jax.block_until_ready(out)

    ref = reference(query, key_in, value, params, mask)
    err = float(np.max(np.abs(np.asarray(out) - np.asarray(ref))))
    # tolerance accommodates the approx (EUP) reciprocal in the softmax normalization
    assert np.allclose(np.asarray(out), np.asarray(ref), atol=2e-3, rtol=2e-3), err

    print("KERNEL_OK")
</pallas_src>

<mosaic_0001>
module attributes {stable_mosaic.version = 11 : i64} {
  func.func @_mha_kernel(%arg0: memref<2x8x16xf32, #tpu.memory_space<vmem>>, %arg1: memref<2x8x16xf32, #tpu.memory_space<vmem>>, %arg2: memref<2x8x16xf32, #tpu.memory_space<vmem>>, %arg3: memref<2x8x1xf32, #tpu.memory_space<vmem>>, %arg4: memref<16x256xf32, #tpu.memory_space<vmem>>, %arg5: memref<16x256xf32, #tpu.memory_space<vmem>>, %arg6: memref<16x256xf32, #tpu.memory_space<vmem>>, %arg7: memref<256x32xf32, #tpu.memory_space<vmem>>, %arg8: memref<2x8x32xf32, #tpu.memory_space<vmem>>) attributes {dimension_semantics = [], scalar_prefetch = 0 : i64, scratch_operands = 0 : i64, tpu.core_type = #tpu.core_type<tc>} {
    %c0 = arith.constant 0 : index
    %c0_0 = arith.constant 0 : index
    %c0_1 = arith.constant 0 : index
    %0 = vector.load %arg0[%c0, %c0_0, %c0_1] : memref<2x8x16xf32, #tpu.memory_space<vmem>>, vector<2x8x16xf32>
    %c0_2 = arith.constant 0 : index
    %c0_3 = arith.constant 0 : index
    %c0_4 = arith.constant 0 : index
    %1 = vector.load %arg1[%c0_2, %c0_3, %c0_4] : memref<2x8x16xf32, #tpu.memory_space<vmem>>, vector<2x8x16xf32>
    %c0_5 = arith.constant 0 : index
    %c0_6 = arith.constant 0 : index
    %c0_7 = arith.constant 0 : index
    %2 = vector.load %arg2[%c0_5, %c0_6, %c0_7] : memref<2x8x16xf32, #tpu.memory_space<vmem>>, vector<2x8x16xf32>
    %c0_8 = arith.constant 0 : index
    %c0_9 = arith.constant 0 : index
    %3 = vector.load %arg4[%c0_8, %c0_9] : memref<16x256xf32, #tpu.memory_space<vmem>>, vector<16x256xf32>
    %c0_10 = arith.constant 0 : index
    %c0_11 = arith.constant 0 : index
    %4 = vector.load %arg5[%c0_10, %c0_11] : memref<16x256xf32, #tpu.memory_space<vmem>>, vector<16x256xf32>
    %c0_12 = arith.constant 0 : index
    %c0_13 = arith.constant 0 : index
    %5 = vector.load %arg6[%c0_12, %c0_13] : memref<16x256xf32, #tpu.memory_space<vmem>>, vector<16x256xf32>
    %c0_14 = arith.constant 0 : index
    %c0_15 = arith.constant 0 : index
    %6 = vector.load %arg7[%c0_14, %c0_15] : memref<256x32xf32, #tpu.memory_space<vmem>>, vector<256x32xf32>
    "tpu.trace_start"() <{level = 10 : i32, message = "bsk,kd->bsd"}> : () -> ()
    %cst = arith.constant dense<0.000000e+00> : vector<2x8x256xf32>
    %7 = tpu.matmul %0, %3, %cst {dimension_numbers = #tpu.dot_dimension_numbers<[2], [0], [0, 1], [1], [0, 0, 0, 1, 1, 1], [], []>} : vector<2x8x16xf32>, vector<16x256xf32>, vector<2x8x256xf32> -> vector<2x8x256xf32>
    "tpu.trace_stop"() : () -> ()
    %cst_16 = arith.constant 2.500000e-01 : f32
    %8 = vector.broadcast %cst_16 : f32 to vector<2x8x256xf32>
    %9 = arith.mulf %7, %8 : vector<2x8x256xf32>
    "tpu.trace_start"() <{level = 10 : i32, message = "bsk,kd->bsd"}> : () -> ()
    %cst_17 = arith.constant dense<0.000000e+00> : vector<2x8x256xf32>
    %10 = tpu.matmul %1, %4, %cst_17 {dimension_numbers = #tpu.dot_dimension_numbers<[2], [0], [0, 1], [1], [0, 0, 0, 1, 1, 1], [], []>} : vector<2x8x16xf32>, vector<16x256xf32>, vector<2x8x256xf32> -> vector<2x8x256xf32>
    "tpu.trace_stop"() : () -> ()
    "tpu.trace_start"() <{level = 10 : i32, message = "bsv,vd->bsd"}> : () -> ()
    %cst_18 = arith.constant dense<0.000000e+00> : vector<2x8x256xf32>
    %11 = tpu.matmul %2, %5, %cst_18 {dimension_numbers = #tpu.dot_dimension_numbers<[2], [0], [0, 1], [1], [0, 0, 0, 1, 1, 1], [], []>} : vector<2x8x16xf32>, vector<16x256xf32>, vector<2x8x256xf32> -> vector<2x8x256xf32>
    "tpu.trace_stop"() : () -> ()
    %c0_19 = arith.constant 0 : index
    %c0_20 = arith.constant 0 : index
    %c0_21 = arith.constant 0 : index
    %12 = vector.load %arg3[%c0_19, %c0_20, %c0_21] : memref<2x8x1xf32, #tpu.memory_space<vmem>>, vector<2x8x1xf32>
    %13 = math.log %12 : vector<2x8x1xf32>
    %cst_22 = arith.constant -3.40282347E+38 : f32
    %14 = vector.broadcast %cst_22 : f32 to vector<2x8x1xf32>
    %15 = arith.maximumf %13, %14 : vector<2x8x1xf32>
    %cst_23 = arith.constant 0.000000e+00 : f32
    %16 = vector.broadcast %cst_23 : f32 to vector<2x8x32xf32>
    %17 = vector.extract_strided_slice %9 {offsets = [0, 0, 0], sizes = [2, 8, 32], strides = [1, 1, 1]} : vector<2x8x256xf32> to vector<2x8x32xf32>
    %18 = vector.extract_strided_slice %10 {offsets = [0, 0, 0], sizes = [2, 8, 32], strides = [1, 1, 1]} : vector<2x8x256xf32> to vector<2x8x32xf32>
    %19 = vector.extract_strided_slice %11 {offsets = [0, 0, 0], sizes = [2, 8, 32], strides = [1, 1, 1]} : vector<2x8x256xf32> to vector<2x8x32xf32>
    "tpu.trace_start"() <{level = 10 : i32, message = "bqd,bkd->bqk"}> : () -> ()
    %cst_24 = arith.constant dense<0.000000e+00> : vector<2x8x8xf32>
    %20 = tpu.matmul %17, %18, %cst_24 {dimension_numbers = #tpu.dot_dimension_numbers<[2], [2], [1], [1], [0, 0, 0, 1, 1, 1], [0], [0]>} : vector<2x8x32xf32>, vector<2x8x32xf32>, vector<2x8x8xf32> -> vector<2x8x8xf32>
    "tpu.trace_stop"() : () -> ()
    %21 = vector.broadcast %15 : vector<2x8x1xf32> to vector<2x8x8xf32>
    %22 = arith.addf %20, %21 : vector<2x8x8xf32>
    %cst_25 = arith.constant dense<0xFF800000> : vector<2x8xf32>
    %23 = vector.multi_reduction <maximumf>, %22, %cst_25 [1] : vector<2x8x8xf32> to vector<2x8xf32>
    %24 = vector.shape_cast %23 : vector<2x8xf32> to vector<2x1x8xf32>
    %25 = vector.broadcast %24 : vector<2x1x8xf32> to vector<2x8x8xf32>
    %26 = arith.subf %22, %25 : vector<2x8x8xf32>
    %27 = math.exp %26 : vector<2x8x8xf32>
    %cst_26 = arith.constant dense<0.000000e+00> : vector<2x8xf32>
    %28 = vector.multi_reduction <add>, %27, %cst_26 [1] : vector<2x8x8xf32> to vector<2x8xf32>
    %29 = vector.shape_cast %28 : vector<2x8xf32> to vector<2x1x8xf32>
    %30 = tpu.reciprocal %29 {approx = true} : vector<2x1x8xf32> -> vector<2x1x8xf32>
    %31 = vector.broadcast %30 : vector<2x1x8xf32> to vector<2x8x8xf32>
    %32 = arith.mulf %27, %31 : vector<2x8x8xf32>
    "tpu.trace_start"() <{level = 10 : i32, message = "bqk,bkd->bqd"}> : () -> ()
    %cst_27 = arith.constant dense<0.000000e+00> : vector<2x8x32xf32>
    %33 = tpu.matmul %32, %19, %cst_27 {dimension_numbers = #tpu.dot_dimension_numbers<[2], [1], [1], [2], [0, 0, 0, 1, 1, 2], [0], [0]>} : vector<2x8x8xf32>, vector<2x8x32xf32>, vector<2x8x32xf32> -> vector<2x8x32xf32>
    "tpu.trace_stop"() : () -> ()
    %34 = vector.extract_strided_slice %6 {offsets = [0, 0], sizes = [32, 32], strides = [1, 1]} : vector<256x32xf32> to vector<32x32xf32>
    "tpu.trace_start"() <{level = 10 : i32, message = "bqd,de->bqe"}> : () -> ()
    %cst_28 = arith.constant dense<0.000000e+00> : vector<2x8x32xf32>
    %35 = tpu.matmul %33, %34, %cst_28 {dimension_numbers = #tpu.dot_dimension_numbers<[2], [0], [0, 1], [1], [0, 0, 0, 1, 1, 1], [], []>} : vector<2x8x32xf32>, vector<32x32xf32>, vector<2x8x32xf32> -> vector<2x8x32xf32>
    "tpu.trace_stop"() : () -> ()
    %36 = arith.addf %16, %35 : vector<2x8x32xf32>
    %37 = vector.extract_strided_slice %9 {offsets = [0, 0, 32], sizes = [2, 8, 32], strides = [1, 1, 1]} : vector<2x8x256xf32> to vector<2x8x32xf32>
    %38 = vector.extract_strided_slice %10 {offsets = [0, 0, 32], sizes = [2, 8, 32], strides = [1, 1, 1]} : vector<2x8x256xf32> to vector<2x8x32xf32>
    %39 = vector.extract_strided_slice %11 {offsets = [0, 0, 32], sizes = [2, 8, 32], strides = [1, 1, 1]} : vector<2x8x256xf32> to vector<2x8x32xf32>
    "tpu.trace_start"() <{level = 10 : i32, message = "bqd,bkd->bqk"}> : () -> ()
    %cst_29 = arith.constant dense<0.000000e+00> : vector<2x8x8xf32>
    %40 = tpu.matmul %37, %38, %cst_29 {dimension_numbers = #tpu.dot_dimension_numbers<[2], [2], [1], [1], [0, 0, 0, 1, 1, 1], [0], [0]>} : vector<2x8x32xf32>, vector<2x8x32xf32>, vector<2x8x8xf32> -> vector<2x8x8xf32>
    "tpu.trace_stop"() : () -> ()
    %41 = vector.broadcast %15 : vector<2x8x1xf32> to vector<2x8x8xf32>
    %42 = arith.addf %40, %41 : vector<2x8x8xf32>
    %cst_30 = arith.constant dense<0xFF800000> : vector<2x8xf32>
    %43 = vector.multi_reduction <maximumf>, %42, %cst_30 [1] : vector<2x8x8xf32> to vector<2x8xf32>
    %44 = vector.shape_cast %43 : vector<2x8xf32> to vector<2x1x8xf32>
    %45 = vector.broadcast %44 : vector<2x1x8xf32> to vector<2x8x8xf32>
    %46 = arith.subf %42, %45 : vector<2x8x8xf32>
    %47 = math.exp %46 : vector<2x8x8xf32>
    %cst_31 = arith.constant dense<0.000000e+00> : vector<2x8xf32>
    %48 = vector.multi_reduction <add>, %47, %cst_31 [1] : vector<2x8x8xf32> to vector<2x8xf32>
    %49 = vector.shape_cast %48 : vector<2x8xf32> to vector<2x1x8xf32>
    %50 = tpu.reciprocal %49 {approx = true} : vector<2x1x8xf32> -> vector<2x1x8xf32>
    %51 = vector.broadcast %50 : vector<2x1x8xf32> to vector<2x8x8xf32>
    %52 = arith.mulf %47, %51 : vector<2x8x8xf32>
    "tpu.trace_start"() <{level = 10 : i32, message = "bqk,bkd->bqd"}> : () -> ()
    %cst_32 = arith.constant dense<0.000000e+00> : vector<2x8x32xf32>
    %53 = tpu.matmul %52, %39, %cst_32 {dimension_numbers = #tpu.dot_dimension_numbers<[2], [1], [1], [2], [0, 0, 0, 1, 1, 2], [0], [0]>} : vector<2x8x8xf32>, vector<2x8x32xf32>, vector<2x8x32xf32> -> vector<2x8x32xf32>
    "tpu.trace_stop"() : () -> ()
    %54 = vector.extract_strided_slice %6 {offsets = [32, 0], sizes = [32, 32], strides = [1, 1]} : vector<256x32xf32> to vector<32x32xf32>
    "tpu.trace_start"() <{level = 10 : i32, message = "bqd,de->bqe"}> : () -> ()
    %cst_33 = arith.constant dense<0.000000e+00> : vector<2x8x32xf32>
    %55 = tpu.matmul %53, %54, %cst_33 {dimension_numbers = #tpu.dot_dimension_numbers<[2], [0], [0, 1], [1], [0, 0, 0, 1, 1, 1], [], []>} : vector<2x8x32xf32>, vector<32x32xf32>, vector<2x8x32xf32> -> vector<2x8x32xf32>
    "tpu.trace_stop"() : () -> ()
    %56 = arith.addf %36, %55 : vector<2x8x32xf32>
    %57 = vector.extract_strided_slice %9 {offsets = [0, 0, 64], sizes = [2, 8, 32], strides = [1, 1, 1]} : vector<2x8x256xf32> to vector<2x8x32xf32>
    %58 = vector.extract_strided_slice %10 {offsets = [0, 0, 64], sizes = [2, 8, 32], strides = [1, 1, 1]} : vector<2x8x256xf32> to vector<2x8x32xf32>
    %59 = vector.extract_strided_slice %11 {offsets = [0, 0, 64], sizes = [2, 8, 32], strides = [1, 1, 1]} : vector<2x8x256xf32> to vector<2x8x32xf32>
    "tpu.trace_start"() <{level = 10 : i32, message = "bqd,bkd->bqk"}> : () -> ()
    %cst_34 = arith.constant dense<0.000000e+00> : vector<2x8x8xf32>
    %60 = tpu.matmul %57, %58, %cst_34 {dimension_numbers = #tpu.dot_dimension_numbers<[2], [2], [1], [1], [0, 0, 0, 1, 1, 1], [0], [0]>} : vector<2x8x32xf32>, vector<2x8x32xf32>, vector<2x8x8xf32> -> vector<2x8x8xf32>
    "tpu.trace_stop"() : () -> ()
    %61 = vector.broadcast %15 : vector<2x8x1xf32> to vector<2x8x8xf32>
    %62 = arith.addf %60, %61 : vector<2x8x8xf32>
    %cst_35 = arith.constant dense<0xFF800000> : vector<2x8xf32>
    %63 = vector.multi_reduction <maximumf>, %62, %cst_35 [1] : vector<2x8x8xf32> to vector<2x8xf32>
    %64 = vector.shape_cast %63 : vector<2x8xf32> to vector<2x1x8xf32>
    %65 = vector.broadcast %64 : vector<2x1x8xf32> to vector<2x8x8xf32>
    %66 = arith.subf %62, %65 : vector<2x8x8xf32>
    %67 = math.exp %66 : vector<2x8x8xf32>
    %cst_36 = arith.constant dense<0.000000e+00> : vector<2x8xf32>
    %68 = vector.multi_reduction <add>, %67, %cst_36 [1] : vector<2x8x8xf32> to vector<2x8xf32>
    %69 = vector.shape_cast %68 : vector<2x8xf32> to vector<2x1x8xf32>
    %70 = tpu.reciprocal %69 {approx = true} : vector<2x1x8xf32> -> vector<2x1x8xf32>
    %71 = vector.broadcast %70 : vector<2x1x8xf32> to vector<2x8x8xf32>
    %72 = arith.mulf %67, %71 : vector<2x8x8xf32>
    "tpu.trace_start"() <{level = 10 : i32, message = "bqk,bkd->bqd"}> : () -> ()
    %cst_37 = arith.constant dense<0.000000e+00> : vector<2x8x32xf32>
    %73 = tpu.matmul %72, %59, %cst_37 {dimension_numbers = #tpu.dot_dimension_numbers<[2], [1], [1], [2], [0, 0, 0, 1, 1, 2], [0], [0]>} : vector<2x8x8xf32>, vector<2x8x32xf32>, vector<2x8x32xf32> -> vector<2x8x32xf32>
    "tpu.trace_stop"() : () -> ()
    %74 = vector.extract_strided_slice %6 {offsets = [64, 0], sizes = [32, 32], strides = [1, 1]} : vector<256x32xf32> to vector<32x32xf32>
    "tpu.trace_start"() <{level = 10 : i32, message = "bqd,de->bqe"}> : () -> ()
    %cst_38 = arith.constant dense<0.000000e+00> : vector<2x8x32xf32>
    %75 = tpu.matmul %73, %74, %cst_38 {dimension_numbers = #tpu.dot_dimension_numbers<[2], [0], [0, 1], [1], [0, 0, 0, 1, 1, 1], [], []>} : vector<2x8x32xf32>, vector<32x32xf32>, vector<2x8x32xf32> -> vector<2x8x32xf32>
    "tpu.trace_stop"() : () -> ()
    %76 = arith.addf %56, %75 : vector<2x8x32xf32>
    %77 = vector.extract_strided_slice %9 {offsets = [0, 0, 96], sizes = [2, 8, 32], strides = [1, 1, 1]} : vector<2x8x256xf32> to vector<2x8x32xf32>
    %78 = vector.extract_strided_slice %10 {offsets = [0, 0, 96], sizes = [2, 8, 32], strides = [1, 1, 1]} : vector<2x8x256xf32> to vector<2x8x32xf32>
    %79 = vector.extract_strided_slice %11 {offsets = [0, 0, 96], sizes = [2, 8, 32], strides = [1, 1, 1]} : vector<2x8x256xf32> to vector<2x8x32xf32>
    "tpu.trace_start"() <{level = 10 : i32, message = "bqd,bkd->bqk"}> : () -> ()
    %cst_39 = arith.constant dense<0.000000e+00> : vector<2x8x8xf32>
    %80 = tpu.matmul %77, %78, %cst_39 {dimension_numbers = #tpu.dot_dimension_numbers<[2], [2], [1], [1], [0, 0, 0, 1, 1, 1], [0], [0]>} : vector<2x8x32xf32>, vector<2x8x32xf32>, vector<2x8x8xf32> -> vector<2x8x8xf32>
    "tpu.trace_stop"() : () -> ()
    %81 = vector.broadcast %15 : vector<2x8x1xf32> to vector<2x8x8xf32>
    %82 = arith.addf %80, %81 : vector<2x8x8xf32>
    %cst_40 = arith.constant dense<0xFF800000> : vector<2x8xf32>
    %83 = vector.multi_reduction <maximumf>, %82, %cst_40 [1] : vector<2x8x8xf32> to vector<2x8xf32>
    %84 = vector.shape_cast %83 : vector<2x8xf32> to vector<2x1x8xf32>
    %85 = vector.broadcast %84 : vector<2x1x8xf32> to vector<2x8x8xf32>
    %86 = arith.subf %82, %85 : vector<2x8x8xf32>
    %87 = math.exp %86 : vector<2x8x8xf32>
    %cst_41 = arith.constant dense<0.000000e+00> : vector<2x8xf32>
    %88 = vector.multi_reduction <add>, %87, %cst_41 [1] : vector<2x8x8xf32> to vector<2x8xf32>
    %89 = vector.shape_cast %88 : vector<2x8xf32> to vector<2x1x8xf32>
    %90 = tpu.reciprocal %89 {approx = true} : vector<2x1x8xf32> -> vector<2x1x8xf32>
    %91 = vector.broadcast %90 : vector<2x1x8xf32> to vector<2x8x8xf32>
    %92 = arith.mulf %87, %91 : vector<2x8x8xf32>
    "tpu.trace_start"() <{level = 10 : i32, message = "bqk,bkd->bqd"}> : () -> ()
    %cst_42 = arith.constant dense<0.000000e+00> : vector<2x8x32xf32>
    %93 = tpu.matmul %92, %79, %cst_42 {dimension_numbers = #tpu.dot_dimension_numbers<[2], [1], [1], [2], [0, 0, 0, 1, 1, 2], [0], [0]>} : vector<2x8x8xf32>, vector<2x8x32xf32>, vector<2x8x32xf32> -> vector<2x8x32xf32>
    "tpu.trace_stop"() : () -> ()
    %94 = vector.extract_strided_slice %6 {offsets = [96, 0], sizes = [32, 32], strides = [1, 1]} : vector<256x32xf32> to vector<32x32xf32>
    "tpu.trace_start"() <{level = 10 : i32, message = "bqd,de->bqe"}> : () -> ()
    %cst_43 = arith.constant dense<0.000000e+00> : vector<2x8x32xf32>
    %95 = tpu.matmul %93, %94, %cst_43 {dimension_numbers = #tpu.dot_dimension_numbers<[2], [0], [0, 1], [1], [0, 0, 0, 1, 1, 1], [], []>} : vector<2x8x32xf32>, vector<32x32xf32>, vector<2x8x32xf32> -> vector<2x8x32xf32>
    "tpu.trace_stop"() : () -> ()
    %96 = arith.addf %76, %95 : vector<2x8x32xf32>
    %97 = vector.extract_strided_slice %9 {offsets = [0, 0, 128], sizes = [2, 8, 32], strides = [1, 1, 1]} : vector<2x8x256xf32> to vector<2x8x32xf32>
    %98 = vector.extract_strided_slice %10 {offsets = [0, 0, 128], sizes = [2, 8, 32], strides = [1, 1, 1]} : vector<2x8x256xf32> to vector<2x8x32xf32>
    %99 = vector.extract_strided_slice %11 {offsets = [0, 0, 128], sizes = [2, 8, 32], strides = [1, 1, 1]} : vector<2x8x256xf32> to vector<2x8x32xf32>
    "tpu.trace_start"() <{level = 10 : i32, message = "bqd,bkd->bqk"}> : () -> ()
    %cst_44 = arith.constant dense<0.000000e+00> : vector<2x8x8xf32>
    %100 = tpu.matmul %97, %98, %cst_44 {dimension_numbers = #tpu.dot_dimension_numbers<[2], [2], [1], [1], [0, 0, 0, 1, 1, 1], [0], [0]>} : vector<2x8x32xf32>, vector<2x8x32xf32>, vector<2x8x8xf32> -> vector<2x8x8xf32>
    "tpu.trace_stop"() : () -> ()
    %101 = vector.broadcast %15 : vector<2x8x1xf32> to vector<2x8x8xf32>
    %102 = arith.addf %100, %101 : vector<2x8x8xf32>
    %cst_45 = arith.constant dense<0xFF800000> : vector<2x8xf32>
    %103 = vector.multi_reduction <maximumf>, %102, %cst_45 [1] : vector<2x8x8xf32> to vector<2x8xf32>
    %104 = vector.shape_cast %103 : vector<2x8xf32> to vector<2x1x8xf32>
    %105 = vector.broadcast %104 : vector<2x1x8xf32> to vector<2x8x8xf32>
    %106 = arith.subf %102, %105 : vector<2x8x8xf32>
    %107 = math.exp %106 : vector<2x8x8xf32>
    %cst_46 = arith.constant dense<0.000000e+00> : vector<2x8xf32>
    %108 = vector.multi_reduction <add>, %107, %cst_46 [1] : vector<2x8x8xf32> to vector<2x8xf32>
    %109 = vector.shape_cast %108 : vector<2x8xf32> to vector<2x1x8xf32>
    %110 = tpu.reciprocal %109 {approx = true} : vector<2x1x8xf32> -> vector<2x1x8xf32>
    %111 = vector.broadcast %110 : vector<2x1x8xf32> to vector<2x8x8xf32>
    %112 = arith.mulf %107, %111 : vector<2x8x8xf32>
    "tpu.trace_start"() <{level = 10 : i32, message = "bqk,bkd->bqd"}> : () -> ()
    %cst_47 = arith.constant dense<0.000000e+00> : vector<2x8x32xf32>
    %113 = tpu.matmul %112, %99, %cst_47 {dimension_numbers = #tpu.dot_dimension_numbers<[2], [1], [1], [2], [0, 0, 0, 1, 1, 2], [0], [0]>} : vector<2x8x8xf32>, vector<2x8x32xf32>, vector<2x8x32xf32> -> vector<2x8x32xf32>
    "tpu.trace_stop"() : () -> ()
    %114 = vector.extract_strided_slice %6 {offsets = [128, 0], sizes = [32, 32], strides = [1, 1]} : vector<256x32xf32> to vector<32x32xf32>
    "tpu.trace_start"() <{level = 10 : i32, message = "bqd,de->bqe"}> : () -> ()
    %cst_48 = arith.constant dense<0.000000e+00> : vector<2x8x32xf32>
    %115 = tpu.matmul %113, %114, %cst_48 {dimension_numbers = #tpu.dot_dimension_numbers<[2], [0], [0, 1], [1], [0, 0, 0, 1, 1, 1], [], []>} : vector<2x8x32xf32>, vector<32x32xf32>, vector<2x8x32xf32> -> vector<2x8x32xf32>
    "tpu.trace_stop"() : () -> ()
    %116 = arith.addf %96, %115 : vector<2x8x32xf32>
    %117 = vector.extract_strided_slice %9 {offsets = [0, 0, 160], sizes = [2, 8, 32], strides = [1, 1, 1]} : vector<2x8x256xf32> to vector<2x8x32xf32>
    %118 = vector.extract_strided_slice %10 {offsets = [0, 0, 160], sizes = [2, 8, 32], strides = [1, 1, 1]} : vector<2x8x256xf32> to vector<2x8x32xf32>
    %119 = vector.extract_strided_slice %11 {offsets = [0, 0, 160], sizes = [2, 8, 32], strides = [1, 1, 1]} : vector<2x8x256xf32> to vector<2x8x32xf32>
    "tpu.trace_start"() <{level = 10 : i32, message = "bqd,bkd->bqk"}> : () -> ()
    %cst_49 = arith.constant dense<0.000000e+00> : vector<2x8x8xf32>
    %120 = tpu.matmul %117, %118, %cst_49 {dimension_numbers = #tpu.dot_dimension_numbers<[2], [2], [1], [1], [0, 0, 0, 1, 1, 1], [0], [0]>} : vector<2x8x32xf32>, vector<2x8x32xf32>, vector<2x8x8xf32> -> vector<2x8x8xf32>
    "tpu.trace_stop"() : () -> ()
    %121 = vector.broadcast %15 : vector<2x8x1xf32> to vector<2x8x8xf32>
    %122 = arith.addf %120, %121 : vector<2x8x8xf32>
    %cst_50 = arith.constant dense<0xFF800000> : vector<2x8xf32>
    %123 = vector.multi_reduction <maximumf>, %122, %cst_50 [1] : vector<2x8x8xf32> to vector<2x8xf32>
    %124 = vector.shape_cast %123 : vector<2x8xf32> to vector<2x1x8xf32>
    %125 = vector.broadcast %124 : vector<2x1x8xf32> to vector<2x8x8xf32>
    %126 = arith.subf %122, %125 : vector<2x8x8xf32>
    %127 = math.exp %126 : vector<2x8x8xf32>
    %cst_51 = arith.constant dense<0.000000e+00> : vector<2x8xf32>
    %128 = vector.multi_reduction <add>, %127, %cst_51 [1] : vector<2x8x8xf32> to vector<2x8xf32>
    %129 = vector.shape_cast %128 : vector<2x8xf32> to vector<2x1x8xf32>
    %130 = tpu.reciprocal %129 {approx = true} : vector<2x1x8xf32> -> vector<2x1x8xf32>
    %131 = vector.broadcast %130 : vector<2x1x8xf32> to vector<2x8x8xf32>
    %132 = arith.mulf %127, %131 : vector<2x8x8xf32>
    "tpu.trace_start"() <{level = 10 : i32, message = "bqk,bkd->bqd"}> : () -> ()
    %cst_52 = arith.constant dense<0.000000e+00> : vector<2x8x32xf32>
    %133 = tpu.matmul %132, %119, %cst_52 {dimension_numbers = #tpu.dot_dimension_numbers<[2], [1], [1], [2], [0, 0, 0, 1, 1, 2], [0], [0]>} : vector<2x8x8xf32>, vector<2x8x32xf32>, vector<2x8x32xf32> -> vector<2x8x32xf32>
    "tpu.trace_stop"() : () -> ()
    %134 = vector.extract_strided_slice %6 {offsets = [160, 0], sizes = [32, 32], strides = [1, 1]} : vector<256x32xf32> to vector<32x32xf32>
    "tpu.trace_start"() <{level = 10 : i32, message = "bqd,de->bqe"}> : () -> ()
    %cst_53 = arith.constant dense<0.000000e+00> : vector<2x8x32xf32>
    %135 = tpu.matmul %133, %134, %cst_53 {dimension_numbers = #tpu.dot_dimension_numbers<[2], [0], [0, 1], [1], [0, 0, 0, 1, 1, 1], [], []>} : vector<2x8x32xf32>, vector<32x32xf32>, vector<2x8x32xf32> -> vector<2x8x32xf32>
    "tpu.trace_stop"() : () -> ()
    %136 = arith.addf %116, %135 : vector<2x8x32xf32>
    %137 = vector.extract_strided_slice %9 {offsets = [0, 0, 192], sizes = [2, 8, 32], strides = [1, 1, 1]} : vector<2x8x256xf32> to vector<2x8x32xf32>
    %138 = vector.extract_strided_slice %10 {offsets = [0, 0, 192], sizes = [2, 8, 32], strides = [1, 1, 1]} : vector<2x8x256xf32> to vector<2x8x32xf32>
    %139 = vector.extract_strided_slice %11 {offsets = [0, 0, 192], sizes = [2, 8, 32], strides = [1, 1, 1]} : vector<2x8x256xf32> to vector<2x8x32xf32>
    "tpu.trace_start"() <{level = 10 : i32, message = "bqd,bkd->bqk"}> : () -> ()
    %cst_54 = arith.constant dense<0.000000e+00> : vector<2x8x8xf32>
    %140 = tpu.matmul %137, %138, %cst_54 {dimension_numbers = #tpu.dot_dimension_numbers<[2], [2], [1], [1], [0, 0, 0, 1, 1, 1], [0], [0]>} : vector<2x8x32xf32>, vector<2x8x32xf32>, vector<2x8x8xf32> -> vector<2x8x8xf32>
    "tpu.trace_stop"() : () -> ()
    %141 = vector.broadcast %15 : vector<2x8x1xf32> to vector<2x8x8xf32>
    %142 = arith.addf %140, %141 : vector<2x8x8xf32>
    %cst_55 = arith.constant dense<0xFF800000> : vector<2x8xf32>
    %143 = vector.multi_reduction <maximumf>, %142, %cst_55 [1] : vector<2x8x8xf32> to vector<2x8xf32>
    %144 = vector.shape_cast %143 : vector<2x8xf32> to vector<2x1x8xf32>
    %145 = vector.broadcast %144 : vector<2x1x8xf32> to vector<2x8x8xf32>
    %146 = arith.subf %142, %145 : vector<2x8x8xf32>
    %147 = math.exp %146 : vector<2x8x8xf32>
    %cst_56 = arith.constant dense<0.000000e+00> : vector<2x8xf32>
    %148 = vector.multi_reduction <add>, %147, %cst_56 [1] : vector<2x8x8xf32> to vector<2x8xf32>
    %149 = vector.shape_cast %148 : vector<2x8xf32> to vector<2x1x8xf32>
    %150 = tpu.reciprocal %149 {approx = true} : vector<2x1x8xf32> -> vector<2x1x8xf32>
    %151 = vector.broadcast %150 : vector<2x1x8xf32> to vector<2x8x8xf32>
    %152 = arith.mulf %147, %151 : vector<2x8x8xf32>
    "tpu.trace_start"() <{level = 10 : i32, message = "bqk,bkd->bqd"}> : () -> ()
    %cst_57 = arith.constant dense<0.000000e+00> : vector<2x8x32xf32>
    %153 = tpu.matmul %152, %139, %cst_57 {dimension_numbers = #tpu.dot_dimension_numbers<[2], [1], [1], [2], [0, 0, 0, 1, 1, 2], [0], [0]>} : vector<2x8x8xf32>, vector<2x8x32xf32>, vector<2x8x32xf32> -> vector<2x8x32xf32>
    "tpu.trace_stop"() : () -> ()
    %154 = vector.extract_strided_slice %6 {offsets = [192, 0], sizes = [32, 32], strides = [1, 1]} : vector<256x32xf32> to vector<32x32xf32>
    "tpu.trace_start"() <{level = 10 : i32, message = "bqd,de->bqe"}> : () -> ()
    %cst_58 = arith.constant dense<0.000000e+00> : vector<2x8x32xf32>
    %155 = tpu.matmul %153, %154, %cst_58 {dimension_numbers = #tpu.dot_dimension_numbers<[2], [0], [0, 1], [1], [0, 0, 0, 1, 1, 1], [], []>} : vector<2x8x32xf32>, vector<32x32xf32>, vector<2x8x32xf32> -> vector<2x8x32xf32>
    "tpu.trace_stop"() : () -> ()
    %156 = arith.addf %136, %155 : vector<2x8x32xf32>
    %157 = vector.extract_strided_slice %9 {offsets = [0, 0, 224], sizes = [2, 8, 32], strides = [1, 1, 1]} : vector<2x8x256xf32> to vector<2x8x32xf32>
    %158 = vector.extract_strided_slice %10 {offsets = [0, 0, 224], sizes = [2, 8, 32], strides = [1, 1, 1]} : vector<2x8x256xf32> to vector<2x8x32xf32>
    %159 = vector.extract_strided_slice %11 {offsets = [0, 0, 224], sizes = [2, 8, 32], strides = [1, 1, 1]} : vector<2x8x256xf32> to vector<2x8x32xf32>
    "tpu.trace_start"() <{level = 10 : i32, message = "bqd,bkd->bqk"}> : () -> ()
    %cst_59 = arith.constant dense<0.000000e+00> : vector<2x8x8xf32>
    %160 = tpu.matmul %157, %158, %cst_59 {dimension_numbers = #tpu.dot_dimension_numbers<[2], [2], [1], [1], [0, 0, 0, 1, 1, 1], [0], [0]>} : vector<2x8x32xf32>, vector<2x8x32xf32>, vector<2x8x8xf32> -> vector<2x8x8xf32>
    "tpu.trace_stop"() : () -> ()
    %161 = vector.broadcast %15 : vector<2x8x1xf32> to vector<2x8x8xf32>
    %162 = arith.addf %160, %161 : vector<2x8x8xf32>
    %cst_60 = arith.constant dense<0xFF800000> : vector<2x8xf32>
    %163 = vector.multi_reduction <maximumf>, %162, %cst_60 [1] : vector<2x8x8xf32> to vector<2x8xf32>
    %164 = vector.shape_cast %163 : vector<2x8xf32> to vector<2x1x8xf32>
    %165 = vector.broadcast %164 : vector<2x1x8xf32> to vector<2x8x8xf32>
    %166 = arith.subf %162, %165 : vector<2x8x8xf32>
    %167 = math.exp %166 : vector<2x8x8xf32>
    %cst_61 = arith.constant dense<0.000000e+00> : vector<2x8xf32>
    %168 = vector.multi_reduction <add>, %167, %cst_61 [1] : vector<2x8x8xf32> to vector<2x8xf32>
    %169 = vector.shape_cast %168 : vector<2x8xf32> to vector<2x1x8xf32>
    %170 = tpu.reciprocal %169 {approx = true} : vector<2x1x8xf32> -> vector<2x1x8xf32>
    %171 = vector.broadcast %170 : vector<2x1x8xf32> to vector<2x8x8xf32>
    %172 = arith.mulf %167, %171 : vector<2x8x8xf32>
    "tpu.trace_start"() <{level = 10 : i32, message = "bqk,bkd->bqd"}> : () -> ()
    %cst_62 = arith.constant dense<0.000000e+00> : vector<2x8x32xf32>
    %173 = tpu.matmul %172, %159, %cst_62 {dimension_numbers = #tpu.dot_dimension_numbers<[2], [1], [1], [2], [0, 0, 0, 1, 1, 2], [0], [0]>} : vector<2x8x8xf32>, vector<2x8x32xf32>, vector<2x8x32xf32> -> vector<2x8x32xf32>
    "tpu.trace_stop"() : () -> ()
    %174 = vector.extract_strided_slice %6 {offsets = [224, 0], sizes = [32, 32], strides = [1, 1]} : vector<256x32xf32> to vector<32x32xf32>
    "tpu.trace_start"() <{level = 10 : i32, message = "bqd,de->bqe"}> : () -> ()
    %cst_63 = arith.constant dense<0.000000e+00> : vector<2x8x32xf32>
    %175 = tpu.matmul %173, %174, %cst_63 {dimension_numbers = #tpu.dot_dimension_numbers<[2], [0], [0, 1], [1], [0, 0, 0, 1, 1, 1], [], []>} : vector<2x8x32xf32>, vector<32x32xf32>, vector<2x8x32xf32> -> vector<2x8x32xf32>
    "tpu.trace_stop"() : () -> ()
    %176 = arith.addf %156, %175 : vector<2x8x32xf32>
    %c0_64 = arith.constant 0 : index
    %c0_65 = arith.constant 0 : index
    %c0_66 = arith.constant 0 : index
    %177 = vector.load %arg8[%c0_64, %c0_65, %c0_66] : memref<2x8x32xf32, #tpu.memory_space<vmem>>, vector<2x8x32xf32>
    tpu.vector_store %arg8[%c0_64, %c0_65, %c0_66], %176 {strides = array<i32>} : memref<2x8x32xf32, #tpu.memory_space<vmem>>, vector<2x8x32xf32>,
    return
  }
}

</mosaic_0001>

<bundles_post_ra>
// kernel: tpu_custom_call.1
= control target key start
LH: loop header
LB: loop body
LE: loop exit
PB: predicated region body
PF: predicated region fallthrough
CT: control target
= control target key end

     0   :  { %v4319_v4 = vmov 0.0   ;;  %vm80_vm0 = vcmask 130048   ;;  %s4885_s0 = inlined_call_operand.vmem [shape: f32[2,8,16], index: 0, kind: input, shape index: {}]   ;;  %s4886_s1 = inlined_call_operand.vmem [shape: f32[2,8,16], index: 1, kind: input, shape index: {}]   ;;  %s4887_s2 = inlined_call_operand.vmem [shape: f32[2,8,16], index: 2, kind: input, shape index: {}]   ;;  %s4888_s3 = inlined_call_operand.vmem [shape: f32[2,8,1], index: 3, kind: input, shape index: {}]   ;;  %s4889_s4 = inlined_call_operand.vmem [shape: f32[16,256], index: 4, kind: input, shape index: {}]   ;;  %s4890_s5 = inlined_call_operand.vmem [shape: f32[16,256], index: 5, kind: input, shape index: {}]   ;;  %s4891_s6 = inlined_call_operand.vmem [shape: f32[16,256], index: 6, kind: input, shape index: {}]   ;;  %s4892_s7 = inlined_call_operand.vmem [shape: f32[256,32], index: 7, kind: input, shape index: {}]   ;;  %s4893_s8 = inlined_call_operand.hbm [shape: f32[2,8,32], index: 8, kind: output, shape index: {}]  }
   0x1   :  { %v39_v0 = vld [vmem:[%s4889_s4 + $0x18] sm:$0xff]  ;;  %v38_v1 = vld [vmem:[%s4889_s4 + $0x10] sm:$0xff]  ;;  %v37_v2 = vld [vmem:[%s4889_s4 + $0x8] sm:$0xff]  ;;  %157 = vmatprep.mubr.f32.mxu1 %v4319_v4 }
   0x2   :  { %4214 = vmatprep.subr.mxu1 %v39_v0  ;;  %v36_v3 = vld [vmem:[%s4889_s4] sm:$0xff]  ;;  %v31_v5 = vld [vmem:[%s4885_s0 + $0x8] sm:$0xff]  ;;  %v43_v6 = vld [vmem:[%s4890_s5 + $0x18] sm:$0xff]  ;;  %115 = vmatprep.subr.mxu0 %v39_v0 }
   0x3   :  { %4216 = vmatpush1.msra.mxu1 %v38_v1  ;;  %v42_v7 = vld [vmem:[%s4890_s5 + $0x10] sm:$0xff]  ;;  %116 = vmatpush1.msra.mxu0 %v38_v1  ;;  %v41_v8 = vld [vmem:[%s4890_s5 + $0x8] sm:$0xff]  ;;  %v40_v9 = vld [vmem:[%s4890_s5] sm:$0xff] }
   0x4   :  { %4215 = vmatprep.subr.mxu1 %v37_v2  ;;  %117 = vmatprep.subr.mxu0 %v37_v2  ;;  %v32_v10 = vld [vmem:[%s4886_s1] sm:$0xff]  ;;  %v335_v12 = vld [vmem:[%s4888_s3 + $0x8] sm:$0xff] }
   0x5   :  { %4217 = vmatpush1.msra.mxu1 %v36_v3  ;;  %v30_v11 = vld [vmem:[%s4885_s0] sm:$0xff] }
   0x6   :  { %3785 = vmatmul.mubr.msk.f32.vlgmr.msra.gmra.mxu1 %vm80_vm0, %v31_v5  ;;  %202 = vmatprep.subr.mxu1 %v43_v6 }
   0x7   :  { %203 = vmatpush1.msra.mxu1 %v42_v7  ;;  %238 = vmatprep.mubr.f32.mxu1 %v4319_v4 }
   0x8   :  { %13 = vsyncpa [#allocation3], 0  ;;  %204 = vmatprep.subr.mxu1 %v41_v8  ;;  %118 = vmatpush1.msra.mxu0 %v36_v3  ;;  %v47_v13 = vld [vmem:[%s4891_s6 + $0x18] sm:$0xff]  ;;  %4229 = vlog2.f32 %v335_v12  ;;  %v46_v14 = vld [vmem:[%s4891_s6 + $0x10] sm:$0xff]  ;;  %v4320_v19 = vmov 0   ;;  %vm4321_vm1 = vmmov 0  }
   0x9   :  { %205 = vmatpush1.msra.mxu1 %v40_v9  ;;  %151 = vmatprep.mubr.f32.mxu0 %v4319_v4  ;;  %v45_v15 = vld [vmem:[%s4891_s6 + $0x8] sm:$0xff]  ;;  %v44_v17 = vld [vmem:[%s4891_s6] sm:$0xff]  ;;  %vm352_vm2 = vcmask 261120   ;;  %s4324_s18 = smov 32   ;;  %vm505_vm3 = vcmask 64512   ;;  %s4325_s24 = smov [#allocation2]  }
   0xa   :  { %3786 = vmatmul.mubr.msk.f32.vlgmr.msra.gmra.mxu1 %vm80_vm0, %v32_v10  ;;  %3784 = vmatmul.mubr.msk.f32.vlgmr.msra.gmra.mxu0 %vm80_vm0, %v30_v11  ;;  %v33_v16 = vld [vmem:[%s4886_s1 + $0x8] sm:$0xff]  ;;  %v34_v18 = vld [vmem:[%s4887_s2] sm:$0xff]  ;;  %s3773_s25 = sshll.u32 %s4325_s24, 4  ;;  %s3774_s25 = int_to_ptr.vmem [resolvable:$true] %s3773_s25 }
   0xb   :  { %244 = vmatprep.mubr.f32.mxu1 %v4319_v4  ;;  %285 = vmatprep.subr.mxu0 %v47_v13  ;;  %v35_v20 = vld [vmem:[%s4887_s2 + $0x8] sm:$0xff]  ;;  %v334_v24 = vld [vmem:[%s4888_s3] sm:$0xff]  ;;  %s4322_s2 = smov 96   ;;  %s4323_s3 = smov 64  }
   0xc   :  { %286 = vmatpush1.msra.mxu0 %v46_v14  ;;  %321 = vmatprep.mubr.f32.mxu0 %v4319_v4  ;;  %4231 = vlog2.f32 %v334_v24  ;;  %p4302_p1 = scmp.lt.s32.totalorder %s3774_s25, %s3774_s25 }
   0xd   :  { %287 = vmatprep.subr.mxu0 %v45_v15  ;;  %4227 = vset.pattern.permute.xlu0 %v4320_v19 }
   0xe   :  { %3787 = vmatmul.mubr.msk.f32.gmra.mxu1 %vm80_vm0, %v33_v16  ;;  %288 = vmatpush1.msra.mxu0 %v44_v17 }
   0xf   :  { %3788 = vmatmul.mubr.msk.f32.vlgmr.msra.gmra.mxu0 %vm80_vm0, %v34_v18  ;;  %3966 = vmatprep.subr.mxu1 %v4319_v4 }
  0x10   :  { %327 = vmatprep.mubr.f32.mxu0 %v4319_v4  ;;  %4228 = vset.pattern.permute.xlu1 %v4320_v19 }
  0x11   :  { %3976 = vmatprep.subr.mxu0 %v4319_v4  ;;  %3968 = vmatprep.mubr.msk.f32.mxu1 %vm4321_vm1, %v4319_v4 }
  0x13   :  { %3789 = vmatmul.mubr.msk.f32.gmra.mxu0 %vm80_vm0, %v35_v20 }
  0x14   :  { %3978 = vmatprep.mubr.msk.f32.mxu0 %vm4321_vm1, %v4319_v4 }
  0x15   :  { %v4230_v21 = vpop.eup %4229 }
  0x16   :  { %v339_v22 = vmul.f32 0.6931472, %v4230_v21 }
  0x18   :  { %v341_v23 = vmax.f32 %v339_v22, -3.4028235e+38 }
  0x19   :  { %v4232_v25 = vpop.eup %4231 }
  0x1a   :  { %349 = vperm.xlu0 %4227, %v341_v23   ;;  %v337_v26 = vmul.f32 0.6931472, %v4232_v25 }
  0x1c   :  { %v340_v30 = vmax.f32 %v337_v26, -3.4028235e+38 }
  0x95   :  { %v4535_v50 = vpop.permute.xlu0 %349 }
  0xc6   :  { %v159_v27 = vpop.f32.mrf.mxu1 }
  0xc7   :  { %v166_v28 = vmul.f32 0.25, %v159_v27 }
  0xc8   :  { %v161_v29 = vpop.f32.mrf.mxu1 }
  0xc9   :  { %768 = vrot.lane.b32.xlu1 %v166_v28, %s4322_s2  ;;  %v4489_v41 = vmul.f32 0.25, %v161_v29 }
  0xca   :  { %v240_v31 = vpop.f32.mrf.mxu1  ;;  %v153_v32 = vpop.f32.mrf.mxu0 }
  0xcb   :  { %v164_v33 = vmul.f32 0.25, %v153_v32  ;;  %3967 = vmatpush3.xpose.msk.msra.mxu1 %vm352_vm2, %v240_v31 }
  0xcc   :  { %v4453_v34 = vpop.f32.mrf.mxu1  ;;  %3971 = vmatprep.subr.mxu1 %v4319_v4  ;;  %v155_v35 = vpop.f32.mrf.mxu0 }
  0xcd   :  { %344 = vperm.xlu1 %4228, %v340_v30   ;;  %v4484_v40 = vmul.f32 0.25, %v155_v35  ;;  %v4563_v35 = vld [vmem:[%s4892_s7 + $0x18] sm:$0xff] }
  0xce   :  { %v246_v36 = vpop.f32.mrf.mxu1  ;;  %3969 = vmatmul.mubr.msk.f32.vlgmr.msra.gmra.mxu1 %vm352_vm2, %v164_v33 }
  0xcf   :  { %770 = vrot.lane.b32.xlu0 %v246_v36, %s4322_s2  ;;  %3972 = vmatpush3.xpose.msk.msra.mxu1 %vm352_vm2, %v246_v36  ;;  %v323_v37 = vpop.f32.mrf.mxu0 }
  0xd0   :  { %3973 = vmatprep.mubr.msk.f32.mxu1 %vm4321_vm1, %v4319_v4  ;;  %3977 = vmatpush3.msra.mxu0 %v323_v37  ;;  %v4495_v42 = vpop.f32.mrf.mxu1 }
  0xd1   :  { %690 = vrot.lane.b32.xlu1 %v164_v33, %s4322_s2  ;;  %v4462_v38 = vpop.f32.mrf.mxu0  ;;  %3986 = vmatprep.subr.mxu0 %v4319_v4 }
  0xd2   :  { %3974 = vmatmul.mubr.msk.f32.vlgmr.msra.gmra.mxu1 %vm352_vm2, %v166_v28  ;;  %3981 = vmatprep.subr.mxu1 %v4319_v4 }
  0xd3   :  { %692 = vrot.lane.b32.xlu0 %v240_v31, %s4322_s2  ;;  %v329_v39 = vpop.f32.mrf.mxu0  ;;  %3983 = vmatprep.mubr.msk.f32.mxu1 %vm4321_vm1, %v4319_v4 }
  0xd4   :  { %3982 = vmatpush3.msra.mxu1 %v329_v39 }
  0xd5   :  { %1280 = vrot.lane.b32.xlu1 %v246_v36, %s4323_s3  ;;  %3991 = vmatprep.subr.mxu1 %v4319_v4  ;;  %v4499_v43 = vpop.f32.mrf.mxu0 }
  0xd7   :  { %962 = vrot.lane.b32.xlu0 %v329_v39, %s4322_s2 }
  0xd9   :  { %885 = vrot.lane.b32.xlu1 %v323_v37, %s4322_s2 }
  0xdb   :  { %1278 = vrot.lane.b32.xlu0 %v166_v28, %s4323_s3 }
  0xdd   :  { %1631 = vrot.lane.b32.xlu1 %v240_v31, %s4324_s18 }
  0xdf   :  { %1470 = vrot.lane.b32.xlu0 %v329_v39, %s4323_s3 }
  0xe1   :  { %1709 = vrot.lane.b32.xlu1 %v246_v36, %s4324_s18  ;;  %v55_v36 = vld [vmem:[%s4892_s7 + $0x38] sm:$0xff] }
  0xe3   :  { %1629 = vrot.lane.b32.xlu0 %v164_v33, %s4324_s18 }
  0xe5   :  { %1202 = vrot.lane.b32.xlu1 %v240_v31, %s4323_s3 }
  0xe7   :  { %1707 = vrot.lane.b32.xlu0 %v166_v28, %s4324_s18 }
  0xe9   :  { %1899 = vrot.lane.b32.xlu1 %v329_v39, %s4324_s18 }
  0xeb   :  { %1200 = vrot.lane.b32.xlu0 %v164_v33, %s4323_s3 }
  0xed   :  { %1823 = vrot.lane.b32.xlu1 %v323_v37, %s4324_s18 }
  0xef   :  { %1394 = vrot.lane.b32.xlu0 %v323_v37, %s4323_s3 }
  0xf1   :  { %2477 = vrot.lane.b32.xlu1 %v4484_v40, %s4322_s2 }
  0xf3   :  { %2479 = vrot.lane.b32.xlu0 %v4453_v34, %s4322_s2 }
  0xf5   :  { %2555 = vrot.lane.b32.xlu1 %v4489_v41, %s4322_s2 }
  0xf7   :  { %2557 = vrot.lane.b32.xlu0 %v4495_v42, %s4322_s2 }
  0xf9   :  { %2910 = vrot.lane.b32.xlu1 %v4453_v34, %s4323_s3 }
  0xfb   :  { %2749 = vrot.lane.b32.xlu0 %v4499_v43, %s4322_s2 }
  0xfd   :  { %2988 = vrot.lane.b32.xlu1 %v4495_v42, %s4323_s3 }
  0xff   :  { %2908 = vrot.lane.b32.xlu0 %v4484_v40, %s4323_s3 }
 0x101   :  { %2672 = vrot.lane.b32.xlu1 %v4462_v38, %s4322_s2 }
 0x103   :  { %2986 = vrot.lane.b32.xlu0 %v4489_v41, %s4323_s3 }
 0x105   :  { %3339 = vrot.lane.b32.xlu1 %v4453_v34, %s4324_s18 }
 0x107   :  { %3178 = vrot.lane.b32.xlu0 %v4499_v43, %s4323_s3 }
 0x109   :  { %3417 = vrot.lane.b32.xlu1 %v4495_v42, %s4324_s18 }
 0x10b   :  { %3337 = vrot.lane.b32.xlu0 %v4484_v40, %s4324_s18 }
 0x10d   :  { %3102 = vrot.lane.b32.xlu1 %v4462_v38, %s4323_s3 }
 0x10f   :  { %3415 = vrot.lane.b32.xlu0 %v4489_v41, %s4324_s18 }
 0x111   :  { %3607 = vrot.lane.b32.xlu1 %v4499_v43, %s4324_s18 }
 0x113   :  { %3531 = vrot.lane.b32.xlu0 %v4462_v38, %s4324_s18 }
 0x13b   :  { %v4529_v44 = vpop.permute.xlu1 %768 }
 0x141   :  { %v771_v25 = vpop.permute.xlu0 %770 }
 0x145   :  { %v693_v29 = vpop.permute.xlu0 %692 }
 0x148   :  { %v4531_v45 = vpop.permute.xlu1 %344 }
 0x149   :  { %v963_v33 = vpop.permute.xlu0 %962 }
 0x14c   :  { %v691_v24 = vpop.permute.xlu1 %690 }
 0x150   :  { %v4541_v28 = vpop.permute.xlu1 %1280 }
 0x154   :  { %v886_v32 = vpop.permute.xlu1 %885 }
 0x18e   :  { %v425_v46 = vpop.f32.mrf.mxu1 }
 0x18f   :  { %v426_v47 = vadd.f32 %v425_v46, %v4531_v45 }
 0x190   :  { %v3970_v48 = vpop.f32.mrf.mxu1 }
 0x191   :  { %v506_v49 = vsel %vm505_vm3, %v426_v47, -inf }
 0x192   :  { %v507_v51 = vrot.slane %v506_v49, 4  ;;  %v501_v52 = vpop.f32.mrf.mxu1 }
 0x193   :  { %v502_v53 = vadd.f32 %v501_v52, %v4535_v50 }
 0x194   :  { %v508_v54 = vmax.f32 %v506_v49, %v507_v51  ;;  %v3975_v55 = vpop.f32.mrf.mxu1 }
 0x195   :  { %v513_v56 = vsel %vm505_vm3, %v502_v53, -inf }
 0x196   :  { %v509_v57 = vrot.slane %v508_v54, 2  ;;  %v514_v58 = vrot.slane %v513_v56, 4 }
 0x198   :  { %v510_v59 = vmax.f32 %v508_v54, %v509_v57  ;;  %v515_v60 = vmax.f32 %v513_v56, %v514_v58 }
 0x19a   :  { %v511_v61 = vrot.slane %v510_v59, 1  ;;  %v516_v62 = vrot.slane %v515_v60, 2 }
 0x19c   :  { %v512_v63 = vmax.f32 %v510_v59, %v511_v61  ;;  %v517_v0 = vmax.f32 %v515_v60, %v516_v62 }
 0x19e   :  { %v520_v1 = vsub.f32 %v426_v47, %v512_v63  ;;  %v518_v2 = vrot.slane %v517_v0, 1 }
 0x1a0   :  { %v522_v3 = vmul.f32 1.442695, %v520_v1  ;;  %v519_v5 = vmax.f32 %v517_v0, %v518_v2 }
 0x1a2   :  { %4233 = vpow2.f32 %v522_v3  ;;  %v521_v6 = vsub.f32 %v502_v53, %v519_v5 }
 0x1a4   :  { %v524_v7 = vmul.f32 1.442695, %v521_v6 }
 0x1a6   :  { %4235 = vpow2.f32 %v524_v7 }
 0x1af   :  { %v4234_v8 = vpop.eup %4233 }
 0x1b0   :  { %v526_v9 = vsel %vm505_vm3, %v4234_v8, 0.0 }
 0x1b1   :  { %v527_v10 = vrot.slane %v526_v9, 4 }
 0x1b3   :  { %v4236_v11 = vpop.eup %4235  ;;  %v528_v12 = vadd.f32 %v527_v10, %v526_v9 }
 0x1b4   :  { %v533_v13 = vsel %vm505_vm3, %v4236_v11, 0.0 }
 0x1b5   :  { %v529_v14 = vrot.slane %v528_v12, 2  ;;  %v534_v15 = vrot.slane %v533_v13, 4 }
 0x1b7   :  { %v530_v16 = vadd.f32 %v529_v14, %v528_v12  ;;  %v535_v17 = vadd.f32 %v534_v15, %v533_v13 }
 0x1b9   :  { %v531_v18 = vrot.slane %v530_v16, 1  ;;  %v536_v19 = vrot.slane %v535_v17, 2 }
 0x1bb   :  { %v532_v20 = vadd.f32 %v531_v18, %v530_v16  ;;  %v537_v21 = vadd.f32 %v536_v19, %v535_v17 }
 0x1bd   :  { %4237 = vrcp.f32 %v532_v20  ;;  %v538_v22 = vrot.slane %v537_v21, 1 }
 0x1bf   :  { %v539_v23 = vadd.f32 %v538_v22, %v537_v21 }
 0x1c1   :  { %4239 = vrcp.f32 %v539_v23 }
 0x1ca   :  { %v4238_v26 = vpop.eup %4237 }
 0x1cb   :  { %v542_v27 = vmul.f32 %v4238_v26, %v4234_v8 }
 0x1cd   :  { %3979 = vmatmul.mubr.msk.f32.vlgmr.msra.gmra.mxu0 %vm505_vm3, %v542_v27  ;;  %v54_v27 = vld [vmem:[%s4892_s7 + $0x30] sm:$0xff] }
 0x1ce   :  { %v4240_v30 = vpop.eup %4239  ;;  %3987 = vmatpush3.xpose.msk.msra.mxu0 %vm352_vm2, %v693_v29  ;;  %3988 = vmatprep.mubr.msk.f32.mxu0 %vm4321_vm1, %v4319_v4 }
 0x1cf   :  { %v543_v31 = vmul.f32 %v4240_v30, %v4236_v11  ;;  %3996 = vmatprep.subr.mxu0 %v4319_v4 }
 0x1d1   :  { %3984 = vmatmul.mubr.msk.f32.vlgmr.msra.gmra.mxu1 %vm505_vm3, %v543_v31  ;;  %3989 = vmatmul.mubr.msk.f32.vlgmr.msra.gmra.mxu0 %vm352_vm2, %v691_v24  ;;  %v50_v31 = vld [vmem:[%s4892_s7 + $0x10] sm:$0xff] }
 0x1d2   :  { %3992 = vmatpush3.xpose.msk.msra.mxu1 %vm352_vm2, %v771_v25  ;;  %3993 = vmatprep.mubr.msk.f32.mxu1 %vm4321_vm1, %v4319_v4 }
 0x1d3   :  { %3997 = vmatpush3.msra.mxu0 %v886_v32  ;;  %4001 = vmatprep.subr.mxu1 %v4319_v4  ;;  %v49_v32 = vld [vmem:[%s4892_s7 + $0x8] sm:$0xff] }
 0x1d4   :  { %3998 = vmatprep.mubr.msk.f32.mxu0 %vm4321_vm1, %v4319_v4  ;;  %4006 = vmatprep.subr.mxu0 %v55_v36 }
 0x1d5   :  { %3994 = vmatmul.mubr.msk.f32.vlgmr.msra.gmra.mxu1 %vm352_vm2, %v4529_v44 }
 0x1d6   :  { %4002 = vmatpush3.msra.mxu1 %v963_v33  ;;  %4003 = vmatprep.mubr.msk.f32.mxu1 %vm4321_vm1, %v4319_v4  ;;  %v48_v33 = vld [vmem:[%s4892_s7] sm:$0xff] }
 0x1d7   :  { %4017 = vmatprep.subr.mxu1 %v4563_v35 }
 0x28d   :  { %v613_v37 = vpop.f32.mrf.mxu0 }
 0x28f   :  { %v3980_v39 = vpop.f32.mrf.mxu0 }
 0x291   :  { %v4569_v46 = vpop.f32.mrf.mxu1  ;;  %v764_v44 = vpop.f32.mrf.mxu0 }
 0x292   :  { %v765_v47 = vadd.f32 %v764_v44, %v4531_v45 }
 0x293   :  { %v3985_v48 = vpop.f32.mrf.mxu1  ;;  %v3990_v49 = vpop.f32.mrf.mxu0 }
 0x294   :  { %v846_v51 = vsel %vm505_vm3, %v765_v47, -inf }
 0x295   :  { %v847_v52 = vrot.slane %v846_v51, 4  ;;  %v842_v53 = vpop.f32.mrf.mxu1 }
 0x296   :  { %v843_v54 = vadd.f32 %v842_v53, %v4535_v50 }
 0x297   :  { %v848_v55 = vmax.f32 %v846_v51, %v847_v52  ;;  %v3995_v56 = vpop.f32.mrf.mxu1 }
 0x298   :  { %v853_v57 = vsel %vm505_vm3, %v843_v54, -inf }
 0x299   :  { %v849_v58 = vrot.slane %v848_v55, 2  ;;  %v854_v59 = vrot.slane %v853_v57, 4 }
 0x29b   :  { %v850_v60 = vmax.f32 %v848_v55, %v849_v58  ;;  %v855_v61 = vmax.f32 %v853_v57, %v854_v59 }
 0x29d   :  { %v851_v62 = vrot.slane %v850_v60, 1  ;;  %v856_v63 = vrot.slane %v855_v61, 2 }
 0x29f   :  { %v852_v0 = vmax.f32 %v850_v60, %v851_v62  ;;  %v857_v1 = vmax.f32 %v855_v61, %v856_v63 }
 0x2a1   :  { %v860_v2 = vsub.f32 %v765_v47, %v852_v0  ;;  %v858_v3 = vrot.slane %v857_v1, 1 }
 0x2a3   :  { %v862_v5 = vmul.f32 1.442695, %v860_v2  ;;  %v859_v6 = vmax.f32 %v857_v1, %v858_v3 }
 0x2a5   :  { %4241 = vpow2.f32 %v862_v5  ;;  %v861_v7 = vsub.f32 %v843_v54, %v859_v6 }
 0x2a7   :  { %v864_v8 = vmul.f32 1.442695, %v861_v7 }
 0x2a9   :  { %4243 = vpow2.f32 %v864_v8 }
 0x2b2   :  { %v4242_v9 = vpop.eup %4241 }
 0x2b3   :  { %v866_v10 = vsel %vm505_vm3, %v4242_v9, 0.0 }
 0x2b4   :  { %v867_v11 = vrot.slane %v866_v10, 4 }
 0x2b6   :  { %v4244_v12 = vpop.eup %4243  ;;  %v868_v13 = vadd.f32 %v867_v11, %v866_v10 }
 0x2b7   :  { %v873_v14 = vsel %vm505_vm3, %v4244_v12, 0.0 }
 0x2b8   :  { %v869_v15 = vrot.slane %v868_v13, 2  ;;  %v874_v16 = vrot.slane %v873_v14, 4 }
 0x2ba   :  { %v870_v17 = vadd.f32 %v869_v15, %v868_v13  ;;  %v875_v18 = vadd.f32 %v874_v16, %v873_v14 }
 0x2bc   :  { %v871_v19 = vrot.slane %v870_v17, 1  ;;  %v876_v20 = vrot.slane %v875_v18, 2 }
 0x2be   :  { %v872_v21 = vadd.f32 %v871_v19, %v870_v17  ;;  %v877_v22 = vadd.f32 %v876_v20, %v875_v18 }
 0x2c0   :  { %4245 = vrcp.f32 %v872_v21  ;;  %v878_v23 = vrot.slane %v877_v22, 1 }
 0x2c2   :  { %v879_v24 = vadd.f32 %v878_v23, %v877_v22 }
 0x2c4   :  { %4247 = vrcp.f32 %v879_v24 }
 0x2cd   :  { %v4246_v25 = vpop.eup %4245 }
 0x2ce   :  { %v882_v26 = vmul.f32 %v4246_v25, %v4242_v9 }
 0x2d0   :  { %3999 = vmatmul.mubr.msk.f32.vlgmr.msra.gmra.mxu0 %vm505_vm3, %v882_v26 }
 0x2d1   :  { %v4248_v29 = vpop.eup %4247  ;;  %4007 = vmatpush3.msra.mxu0 %v55_v36  ;;  %v1279_v36 = vpop.permute.xlu0 %1278 }
 0x2d2   :  { %v883_v30 = vmul.f32 %v4248_v29, %v4244_v12  ;;  %4008 = vmatprep.subr.mxu0 %v54_v27 }
 0x2d3   :  { %4009 = vmatpush3.msra.mxu0 %v54_v27 }
 0x2d4   :  { %4004 = vmatmul.mubr.msk.f32.vlgmr.msra.gmra.mxu1 %vm505_vm3, %v883_v30 }
 0x2d5   :  { %4018 = vmatpush3.msra.mxu1 %v4563_v35  ;;  %4025 = vmatprep.mubr.msk.f32.mxu1 %vm352_vm2, %v613_v37  ;;  %v1471_v35 = vpop.permute.xlu0 %1470  ;;  %v53_v37 = vld [vmem:[%s4892_s7 + $0x28] sm:$0xff] }
 0x2d6   :  { %4019 = vmatprep.subr.mxu1 %v50_v31  ;;  %4010 = vmatprep.subr.mxu0 %v53_v37 }
 0x2d7   :  { %4020 = vmatpush3.msra.mxu1 %v50_v31  ;;  %4011 = vmatpush3.msra.mxu0 %v53_v37 }
 0x2d8   :  { %4021 = vmatprep.subr.mxu1 %v49_v32 }
 0x2d9   :  { %4022 = vmatpush3.msra.mxu1 %v49_v32  ;;  %v1630_v39 = vpop.permute.xlu0 %1629 }
 0x2da   :  { %4023 = vmatprep.subr.mxu1 %v48_v33 }
 0x2db   :  { %4024 = vmatpush3.msra.mxu1 %v48_v33  ;;  %v59_v33 = vld [vmem:[%s4892_s7 + $0x58] sm:$0xff] }
 0x2dc   :  { %4026 = vmatmul.mubr.msk.f32.vlgmr.msra.gmra.mxu1 %vm352_vm2, %v4569_v46  ;;  %4033 = vmatprep.subr.mxu1 %v4319_v4  ;;  %v1632_v46 = vpop.permute.xlu1 %1631 }
 0x2dd   :  { %4034 = vmatpush3.xpose.msk.msra.mxu1 %vm352_vm2, %v4541_v28  ;;  %4035 = vmatprep.mubr.msk.f32.mxu1 %vm4321_vm1, %v4319_v4  ;;  %v52_v28 = vld [vmem:[%s4892_s7 + $0x20] sm:$0xff]  ;;  %v1708_v44 = vpop.permute.xlu0 %1707 }
 0x2de   :  { %4043 = vmatprep.subr.mxu1 %v4319_v4  ;;  %4012 = vmatprep.subr.mxu0 %v52_v28 }
 0x2df   :  { %4013 = vmatpush3.msra.mxu0 %v52_v28 }
 0x2e0   :  { %4036 = vmatmul.mubr.msk.f32.vlgmr.msra.gmra.mxu1 %vm352_vm2, %v1279_v36  ;;  %4028 = vmatprep.subr.mxu0 %v4319_v4  ;;  %v1710_v47 = vpop.permute.xlu1 %1709 }
 0x2e1   :  { %4044 = vmatpush3.msra.mxu1 %v1471_v35  ;;  %4045 = vmatprep.mubr.msk.f32.mxu1 %vm4321_vm1, %v4319_v4  ;;  %v1201_v51 = vpop.permute.xlu0 %1200 }
 0x2e2   :  { %4059 = vmatprep.subr.mxu1 %v4319_v4 }
 0x2e4   :  { %v1203_v53 = vpop.permute.xlu1 %1202 }
 0x2e5   :  { %v1395_v55 = vpop.permute.xlu0 %1394 }
 0x2e8   :  { %v1900_v17 = vpop.permute.xlu1 %1899 }
 0x390   :  { %v957_v48 = vpop.f32.mrf.mxu0 }
 0x391   :  { %4014 = vmatprep.mubr.msk.f32.mxu0 %vm352_vm2, %v957_v48 }
 0x392   :  { %v4000_v49 = vpop.f32.mrf.mxu0 }
 0x394   :  { %v1034_v52 = vpop.f32.mrf.mxu1 }
 0x395   :  { %4015 = vmatmul.mubr.msk.f32.vlgmr.msra.gmra.mxu0 %vm352_vm2, %v1034_v52  ;;  %v57_v52 = vld [vmem:[%s4892_s7 + $0x48] sm:$0xff] }
 0x396   :  { %4029 = vmatpush3.xpose.msk.msra.mxu0 %vm352_vm2, %v1203_v53  ;;  %v4005_v54 = vpop.f32.mrf.mxu1  ;;  %4030 = vmatprep.mubr.msk.f32.mxu0 %vm4321_vm1, %v4319_v4  ;;  %v56_v53 = vld [vmem:[%s4892_s7 + $0x40] sm:$0xff] }
 0x397   :  { %4038 = vmatprep.subr.mxu0 %v4319_v4 }
 0x399   :  { %4031 = vmatmul.mubr.msk.f32.vlgmr.msra.gmra.mxu0 %vm352_vm2, %v1201_v51  ;;  %v58_v51 = vld [vmem:[%s4892_s7 + $0x50] sm:$0xff] }
 0x39a   :  { %4039 = vmatpush3.msra.mxu0 %v1395_v55  ;;  %4040 = vmatprep.mubr.msk.f32.mxu0 %vm4321_vm1, %v4319_v4 }
 0x39b   :  { %4048 = vmatprep.subr.mxu0 %v59_v33 }
 0x39c   :  { %v4621_v56 = vpop.f32.mrf.mxu1 }
 0x39e   :  { %v4623_v57 = vpop.f32.mrf.mxu1 }
 0x3a0   :  { %v1352_v58 = vpop.f32.mrf.mxu1 }
 0x3a1   :  { %v1353_v59 = vadd.f32 %v1352_v58, %v4535_v50 }
 0x3a2   :  { %v4037_v60 = vpop.f32.mrf.mxu1 }
 0x3a3   :  { %v1363_v61 = vsel %vm505_vm3, %v1353_v59, -inf }
 0x3a4   :  { %v1364_v62 = vrot.slane %v1363_v61, 4 }
 0x3a6   :  { %v1365_v63 = vmax.f32 %v1363_v61, %v1364_v62 }
 0x3a8   :  { %v1366_v0 = vrot.slane %v1365_v63, 2 }
 0x3aa   :  { %v1367_v1 = vmax.f32 %v1365_v63, %v1366_v0 }
 0x3ac   :  { %v1368_v2 = vrot.slane %v1367_v1, 1 }
 0x3ae   :  { %v1369_v3 = vmax.f32 %v1367_v1, %v1368_v2 }
 0x3b0   :  { %v1371_v5 = vsub.f32 %v1353_v59, %v1369_v3 }
 0x3b2   :  { %v1374_v6 = vmul.f32 1.442695, %v1371_v5 }
 0x3b4   :  { %4249 = vpow2.f32 %v1374_v6 }
 0x3c1   :  { %v4250_v7 = vpop.eup %4249 }
 0x3c2   :  { %v1383_v8 = vsel %vm505_vm3, %v4250_v7, 0.0 }
 0x3c3   :  { %v1384_v9 = vrot.slane %v1383_v8, 4 }
 0x3c5   :  { %v1385_v10 = vadd.f32 %v1384_v9, %v1383_v8 }
 0x3c7   :  { %v1386_v11 = vrot.slane %v1385_v10, 2 }
 0x3c9   :  { %v1387_v12 = vadd.f32 %v1386_v11, %v1385_v10 }
 0x3cb   :  { %v1388_v13 = vrot.slane %v1387_v12, 1 }
 0x3cd   :  { %v1389_v14 = vadd.f32 %v1388_v13, %v1387_v12 }
 0x3cf   :  { %4251 = vrcp.f32 %v1389_v14 }
 0x3dc   :  { %v4252_v15 = vpop.eup %4251 }
 0x3dd   :  { %v1393_v16 = vmul.f32 %v4252_v15, %v4250_v7 }
 0x3df   :  { %4046 = vmatmul.mubr.msk.f32.vlgmr.msra.gmra.mxu1 %vm505_vm3, %v1393_v16 }
 0x3e0   :  { %4060 = vmatpush3.xpose.msk.msra.mxu1 %vm352_vm2, %v1632_v46  ;;  %4061 = vmatprep.mubr.msk.f32.mxu1 %vm4321_vm1, %v4319_v4 }
 0x3e1   :  { %4064 = vmatprep.subr.mxu1 %v4319_v4 }
 0x3e3   :  { %4062 = vmatmul.mubr.msk.f32.vlgmr.msra.gmra.mxu1 %vm352_vm2, %v1630_v39 }
 0x3e4   :  { %4065 = vmatpush3.xpose.msk.msra.mxu1 %vm352_vm2, %v1710_v47  ;;  %4066 = vmatprep.mubr.msk.f32.mxu1 %vm4321_vm1, %v4319_v4 }
 0x3e5   :  { %4074 = vmatprep.subr.mxu1 %v4319_v4 }
 0x3e7   :  { %4067 = vmatmul.mubr.msk.f32.vlgmr.msra.gmra.mxu1 %vm352_vm2, %v1708_v44 }
 0x3e8   :  { %4075 = vmatpush3.msra.mxu1 %v1900_v17  ;;  %4076 = vmatprep.mubr.msk.f32.mxu1 %vm4321_vm1, %v4319_v4 }
 0x3e9   :  { %4090 = vmatprep.subr.mxu1 %v4319_v4 }
 0x455   :  { %v4642_v18 = vpop.f32.mrf.mxu0 }
 0x457   :  { %v4644_v19 = vpop.f32.mrf.mxu0 }
 0x459   :  { %v1274_v20 = vpop.f32.mrf.mxu0 }
 0x45a   :  { %v1275_v21 = vadd.f32 %v1274_v20, %v4531_v45 }
 0x45b   :  { %v4032_v22 = vpop.f32.mrf.mxu0 }
 0x45c   :  { %v1356_v23 = vsel %vm505_vm3, %v1275_v21, -inf }
 0x45d   :  { %v1357_v24 = vrot.slane %v1356_v23, 4 }
 0x45f   :  { %v1358_v25 = vmax.f32 %v1356_v23, %v1357_v24 }
 0x461   :  { %v1359_v26 = vrot.slane %v1358_v25, 2 }
 0x463   :  { %v1360_v27 = vmax.f32 %v1358_v25, %v1359_v26 }
 0x465   :  { %v1361_v29 = vrot.slane %v1360_v27, 1 }
 0x467   :  { %v1362_v30 = vmax.f32 %v1360_v27, %v1361_v29 }
 0x469   :  { %v1370_v31 = vsub.f32 %v1275_v21, %v1362_v30 }
 0x46b   :  { %v1372_v32 = vmul.f32 1.442695, %v1370_v31 }
 0x46d   :  { %4253 = vpow2.f32 %v1372_v32 }
 0x47a   :  { %v4254_v36 = vpop.eup %4253 }
 0x47b   :  { %v1376_v35 = vsel %vm505_vm3, %v4254_v36, 0.0 }
 0x47c   :  { %v1377_v37 = vrot.slane %v1376_v35, 4 }
 0x47e   :  { %v1378_v28 = vadd.f32 %v1377_v37, %v1376_v35 }
 0x480   :  { %v1379_v39 = vrot.slane %v1378_v28, 2 }
 0x482   :  { %v1380_v46 = vadd.f32 %v1379_v39, %v1378_v28  ;;  %v1824_v28 = vpop.permute.xlu1 %1823 }
 0x484   :  { %v1381_v44 = vrot.slane %v1380_v46, 1 }
 0x486   :  { %v1382_v47 = vadd.f32 %v1381_v44, %v1380_v46  ;;  %v63_v44 = vld [vmem:[%s4892_s7 + $0x78] sm:$0xff] }
 0x488   :  { %4255 = vrcp.f32 %v1382_v47  ;;  %v62_v47 = vld [vmem:[%s4892_s7 + $0x70] sm:$0xff] }
 0x495   :  { %v4256_v48 = vpop.eup %4255 }
 0x496   :  { %v1392_v49 = vmul.f32 %v4256_v48, %v4254_v36  ;;  %v61_v48 = vld [vmem:[%s4892_s7 + $0x68] sm:$0xff] }
 0x498   :  { %4041 = vmatmul.mubr.msk.f32.vlgmr.msra.gmra.mxu0 %vm505_vm3, %v1392_v49  ;;  %v60_v49 = vld [vmem:[%s4892_s7 + $0x60] sm:$0xff] }
 0x499   :  { %4049 = vmatpush3.msra.mxu0 %v59_v33 }
 0x49a   :  { %4050 = vmatprep.subr.mxu0 %v58_v51 }
 0x49b   :  { %4051 = vmatpush3.msra.mxu0 %v58_v51 }
 0x49c   :  { %4052 = vmatprep.subr.mxu0 %v57_v52 }
 0x49d   :  { %4053 = vmatpush3.msra.mxu0 %v57_v52 }
 0x49e   :  { %4054 = vmatprep.subr.mxu0 %v56_v53 }
 0x49f   :  { %v4662_v54 = vpop.f32.mrf.mxu1  ;;  %4055 = vmatpush3.msra.mxu0 %v56_v53 }
 0x4a0   :  { %4069 = vmatprep.subr.mxu0 %v4319_v4 }
 0x4a1   :  { %v4047_v55 = vpop.f32.mrf.mxu1 }
 0x4a3   :  { %v1703_v58 = vpop.f32.mrf.mxu1 }
 0x4a5   :  { %v4063_v59 = vpop.f32.mrf.mxu1 }
 0x4a7   :  { %v1781_v60 = vpop.f32.mrf.mxu1 }
 0x4a8   :  { %v1782_v61 = vadd.f32 %v1781_v60, %v4535_v50 }
 0x4a9   :  { %v4068_v62 = vpop.f32.mrf.mxu1 }
 0x4aa   :  { %v1792_v63 = vsel %vm505_vm3, %v1782_v61, -inf }
 0x4ab   :  { %v1793_v0 = vrot.slane %v1792_v63, 4 }
 0x4ad   :  { %v1794_v1 = vmax.f32 %v1792_v63, %v1793_v0 }
 0x4af   :  { %v1795_v2 = vrot.slane %v1794_v1, 2 }
 0x4b1   :  { %v1796_v3 = vmax.f32 %v1794_v1, %v1795_v2 }
 0x4b3   :  { %v1797_v5 = vrot.slane %v1796_v3, 1 }
 0x4b5   :  { %v1798_v6 = vmax.f32 %v1796_v3, %v1797_v5 }
 0x4b7   :  { %v1800_v7 = vsub.f32 %v1782_v61, %v1798_v6 }
 0x4b9   :  { %v1803_v8 = vmul.f32 1.442695, %v1800_v7 }
 0x4bb   :  { %4257 = vpow2.f32 %v1803_v8 }
 0x4c8   :  { %v4258_v9 = vpop.eup %4257 }
 0x4c9   :  { %v1812_v10 = vsel %vm505_vm3, %v4258_v9, 0.0 }
 0x4ca   :  { %v1813_v11 = vrot.slane %v1812_v10, 4 }
 0x4cc   :  { %v1814_v12 = vadd.f32 %v1813_v11, %v1812_v10 }
 0x4ce   :  { %v1815_v13 = vrot.slane %v1814_v12, 2 }
 0x4d0   :  { %v1816_v14 = vadd.f32 %v1815_v13, %v1814_v12 }
 0x4d2   :  { %v1817_v15 = vrot.slane %v1816_v14, 1 }
 0x4d4   :  { %v1818_v16 = vadd.f32 %v1817_v15, %v1816_v14 }
 0x4d6   :  { %4259 = vrcp.f32 %v1818_v16 }
 0x4e3   :  { %v4260_v17 = vpop.eup %4259 }
 0x4e4   :  { %v1822_v20 = vmul.f32 %v4260_v17, %v4258_v9 }
 0x4e6   :  { %4077 = vmatmul.mubr.msk.f32.vlgmr.msra.gmra.mxu1 %vm505_vm3, %v1822_v20 }
 0x4e7   :  { %4091 = vmatpush3.xpose.msk.msra.mxu1 %vm352_vm2, %v4453_v34  ;;  %4092 = vmatprep.mubr.msk.f32.mxu1 %vm4321_vm1, %v4319_v4  ;;  %v1704_v34 = vadd.f32 %v1703_v58, %v4531_v45 }
 0x4e8   :  { %4095 = vmatprep.subr.mxu1 %v4319_v4 }
 0x4ea   :  { %4093 = vmatmul.mubr.msk.f32.vlgmr.msra.gmra.mxu1 %vm352_vm2, %v4484_v40  ;;  %v1785_v40 = vsel %vm505_vm3, %v1704_v34, -inf }
 0x4eb   :  { %4096 = vmatpush3.xpose.msk.msra.mxu1 %vm352_vm2, %v4495_v42  ;;  %4097 = vmatprep.mubr.msk.f32.mxu1 %vm4321_vm1, %v4319_v4  ;;  %v1786_v42 = vrot.slane %v1785_v40, 4 }
 0x4ec   :  { %4105 = vmatprep.subr.mxu1 %v4319_v4 }
 0x4ed   :  { %v1787_v21 = vmax.f32 %v1785_v40, %v1786_v42 }
 0x4ee   :  { %4098 = vmatmul.mubr.msk.f32.vlgmr.msra.gmra.mxu1 %vm352_vm2, %v4489_v41 }
 0x4ef   :  { %4106 = vmatpush3.msra.mxu1 %v4499_v43  ;;  %4107 = vmatprep.mubr.msk.f32.mxu1 %vm4321_vm1, %v4319_v4  ;;  %v1788_v22 = vrot.slane %v1787_v21, 2 }
 0x4f0   :  { %4121 = vmatprep.subr.mxu1 %v4319_v4 }
 0x4f1   :  { %v1789_v23 = vmax.f32 %v1787_v21, %v1788_v22 }
 0x4f3   :  { %v1790_v24 = vrot.slane %v1789_v23, 1 }
 0x4f5   :  { %v1791_v25 = vmax.f32 %v1789_v23, %v1790_v24  ;;  %v2480_v23 = vpop.permute.xlu0 %2479 }
 0x4f7   :  { %v1799_v26 = vsub.f32 %v1704_v34, %v1791_v25 }
 0x4f9   :  { %v1801_v27 = vmul.f32 1.442695, %v1799_v26  ;;  %v2478_v26 = vpop.permute.xlu1 %2477 }
 0x4fb   :  { %4261 = vpow2.f32 %v1801_v27  ;;  %v2558_v27 = vpop.permute.xlu0 %2557 }
 0x508   :  { %v4262_v41 = vpop.eup %4261 }
 0x509   :  { %v1805_v43 = vsel %vm505_vm3, %v4262_v41, 0.0 }
 0x50a   :  { %v1806_v29 = vrot.slane %v1805_v43, 4 }
 0x50c   :  { %v1807_v30 = vadd.f32 %v1806_v29, %v1805_v43  ;;  %v2556_v43 = vpop.permute.xlu1 %2555  ;;  %v2750_v29 = vpop.permute.xlu0 %2749 }
 0x50e   :  { %v1808_v31 = vrot.slane %v1807_v30, 2 }
 0x510   :  { %v1809_v32 = vadd.f32 %v1808_v31, %v1807_v30 }
 0x512   :  { %v1810_v33 = vrot.slane %v1809_v32, 1 }
 0x514   :  { %v1811_v36 = vadd.f32 %v1810_v33, %v1809_v32 }
 0x516   :  { %4263 = vrcp.f32 %v1811_v36 }
 0x523   :  { %v4264_v37 = vpop.eup %4263 }
 0x524   :  { %v1821_v46 = vmul.f32 %v4264_v37, %v4262_v41 }
 0x558   :  { %v1466_v35 = vpop.f32.mrf.mxu0 }
 0x559   :  { %4056 = vmatprep.mubr.msk.f32.mxu0 %vm352_vm2, %v1466_v35 }
 0x55a   :  { %v4042_v39 = vpop.f32.mrf.mxu0  ;;  %4057 = vmatmul.mubr.msk.f32.vlgmr.msra.gmra.mxu0 %vm352_vm2, %v4662_v54 }
 0x55b   :  { %4070 = vmatpush3.msra.mxu0 %v1824_v28  ;;  %4071 = vmatprep.mubr.msk.f32.mxu0 %vm4321_vm1, %v4319_v4  ;;  %v1197_v28 = vadd.f32 %v4621_v56, %v4642_v18  ;;  %v66_v18 = vld [vmem:[%s4892_s7 + $0x90] sm:$0xff] }
 0x55c   :  { %4079 = vmatprep.subr.mxu0 %v63_v44 }
 0x55e   :  { %4072 = vmatmul.mubr.msk.f32.vlgmr.msra.gmra.mxu0 %vm505_vm3, %v1821_v46  ;;  %v1192_v46 = vadd.f32 %v4623_v57, %v4644_v19  ;;  %v67_v57 = vld [vmem:[%s4892_s7 + $0x98] sm:$0xff]  ;;  %v64_v19 = vld [vmem:[%s4892_s7 + $0x80] sm:$0xff] }
 0x55f   :  { %4080 = vmatpush3.msra.mxu0 %v63_v44 }
 0x560   :  { %4081 = vmatprep.subr.mxu0 %v62_v47 }
 0x561   :  { %4082 = vmatpush3.msra.mxu0 %v62_v47 }
 0x562   :  { %4083 = vmatprep.subr.mxu0 %v61_v48 }
 0x563   :  { %4084 = vmatpush3.msra.mxu0 %v61_v48 }
 0x564   :  { %4085 = vmatprep.subr.mxu0 %v60_v49 }
 0x565   :  { %4086 = vmatpush3.msra.mxu0 %v60_v49 }
 0x566   :  { %4100 = vmatprep.subr.mxu0 %v4319_v4 }
 0x5a6   :  { %v4709_v51 = vpop.f32.mrf.mxu1 }
 0x5a8   :  { %v4078_v52 = vpop.f32.mrf.mxu1 }
 0x5aa   :  { %v2130_v53 = vpop.f32.mrf.mxu1 }
 0x5ab   :  { %v2131_v5 = vadd.f32 %v2130_v53, %v4531_v45 }
 0x5ac   :  { %v4094_v54 = vpop.f32.mrf.mxu1 }
 0x5ad   :  { %v2210_v7 = vsel %vm505_vm3, %v2131_v5, -inf }
 0x5ae   :  { %v2206_v55 = vpop.f32.mrf.mxu1  ;;  %v2211_v8 = vrot.slane %v2210_v7, 4 }
 0x5af   :  { %v2207_v58 = vadd.f32 %v2206_v55, %v4535_v50 }
 0x5b0   :  { %v4099_v59 = vpop.f32.mrf.mxu1  ;;  %v2212_v9 = vmax.f32 %v2210_v7, %v2211_v8 }
 0x5b1   :  { %v2217_v60 = vsel %vm505_vm3, %v2207_v58, -inf }
 0x5b2   :  { %v2218_v61 = vrot.slane %v2217_v60, 4  ;;  %v2213_v11 = vrot.slane %v2212_v9, 2 }
 0x5b4   :  { %v2219_v62 = vmax.f32 %v2217_v60, %v2218_v61  ;;  %v2214_v14 = vmax.f32 %v2212_v9, %v2213_v11 }
 0x5b6   :  { %v2220_v63 = vrot.slane %v2219_v62, 2  ;;  %v2215_v17 = vrot.slane %v2214_v14, 1 }
 0x5b8   :  { %v2221_v0 = vmax.f32 %v2219_v62, %v2220_v63  ;;  %v2216_v40 = vmax.f32 %v2214_v14, %v2215_v17 }
 0x5ba   :  { %v2222_v1 = vrot.slane %v2221_v0, 1  ;;  %v2224_v21 = vsub.f32 %v2131_v5, %v2216_v40 }
 0x5bc   :  { %v2223_v2 = vmax.f32 %v2221_v0, %v2222_v1  ;;  %v2226_v22 = vmul.f32 1.442695, %v2224_v21 }
 0x5be   :  { %v2225_v3 = vsub.f32 %v2207_v58, %v2223_v2 }
 0x5c0   :  { %v2228_v6 = vmul.f32 1.442695, %v2225_v3 }
 0x5c2   :  { %4265 = vpow2.f32 %v2228_v6 }
 0x5cf   :  { %v4266_v10 = vpop.eup %4265 }
 0x5d0   :  { %v2237_v12 = vsel %vm505_vm3, %v4266_v10, 0.0 }
 0x5d1   :  { %v2238_v13 = vrot.slane %v2237_v12, 4 }
 0x5d3   :  { %v2239_v15 = vadd.f32 %v2238_v13, %v2237_v12 }
 0x5d5   :  { %v2240_v16 = vrot.slane %v2239_v15, 2 }
 0x5d7   :  { %v2241_v20 = vadd.f32 %v2240_v16, %v2239_v15 }
 0x5d9   :  { %v2242_v34 = vrot.slane %v2241_v20, 1 }
 0x5db   :  { %v2243_v42 = vadd.f32 %v2242_v34, %v2241_v20 }
 0x5dd   :  { %4267 = vrcp.f32 %v2243_v42 }
 0x5de   :  { %4269 = vpow2.f32 %v2226_v22 }
 0x5ea   :  { %v4268_v24 = vpop.eup %4267 }
 0x5eb   :  { %v2247_v25 = vmul.f32 %v4268_v24, %v4266_v10  ;;  %v4270_v41 = vpop.eup %4269 }
 0x5ec   :  { %v2230_v30 = vsel %vm505_vm3, %v4270_v41, 0.0 }
 0x5ed   :  { %4108 = vmatmul.mubr.msk.f32.vlgmr.msra.gmra.mxu1 %vm505_vm3, %v2247_v25  ;;  %v2231_v31 = vrot.slane %v2230_v30, 4  ;;  %v2911_v25 = vpop.permute.xlu1 %2910 }
 0x5ee   :  { %4122 = vmatpush3.xpose.msk.msra.mxu1 %vm352_vm2, %v2480_v23  ;;  %4123 = vmatprep.mubr.msk.f32.mxu1 %vm4321_vm1, %v4319_v4 }
 0x5ef   :  { %4126 = vmatprep.subr.mxu1 %v4319_v4  ;;  %v2232_v32 = vadd.f32 %v2231_v31, %v2230_v30 }
 0x5f1   :  { %4124 = vmatmul.mubr.msk.f32.vlgmr.msra.gmra.mxu1 %vm352_vm2, %v2478_v26  ;;  %v2233_v33 = vrot.slane %v2232_v32, 2  ;;  %v2989_v31 = vpop.permute.xlu1 %2988 }
 0x5f2   :  { %4127 = vmatpush3.xpose.msk.msra.mxu1 %vm352_vm2, %v2558_v27  ;;  %4128 = vmatprep.mubr.msk.f32.mxu1 %vm4321_vm1, %v4319_v4 }
 0x5f3   :  { %4136 = vmatprep.subr.mxu1 %v4319_v4  ;;  %v2234_v36 = vadd.f32 %v2233_v33, %v2232_v32 }
 0x5f5   :  { %4129 = vmatmul.mubr.msk.f32.vlgmr.msra.gmra.mxu1 %vm352_vm2, %v2556_v43  ;;  %v2235_v35 = vrot.slane %v2234_v36, 1 }
 0x5f6   :  { %4137 = vmatpush3.msra.mxu1 %v2750_v29  ;;  %4138 = vmatprep.mubr.msk.f32.mxu1 %vm4321_vm1, %v4319_v4 }
 0x5f7   :  { %4152 = vmatprep.subr.mxu1 %v4319_v4  ;;  %v2236_v37 = vadd.f32 %v2235_v35, %v2234_v36 }
 0x5f9   :  { %4271 = vrcp.f32 %v2236_v37 }
 0x606   :  { %v4272_v52 = vpop.eup %4271 }
 0x607   :  { %v2246_v56 = vmul.f32 %v4272_v52, %v4270_v41 }
 0x61a   :  { %v4058_v39 = vpop.f32.mrf.mxu0 }
 0x61b   :  { %v4735_v44 = vadd.f32 %v4058_v39, %v1197_v28 }
 0x61c   :  { %v1618_v47 = vpop.f32.mrf.mxu0 }
 0x61d   :  { %v4737_v48 = vadd.f32 %v1618_v47, %v1192_v46  ;;  %v2673_v46 = vpop.permute.xlu1 %2672 }
 0x61e   :  { %v1895_v49 = vpop.f32.mrf.mxu0 }
 0x61f   :  { %4087 = vmatprep.mubr.msk.f32.mxu0 %vm352_vm2, %v1895_v49 }
 0x620   :  { %v4073_v53 = vpop.f32.mrf.mxu0  ;;  %4088 = vmatmul.mubr.msk.f32.vlgmr.msra.gmra.mxu0 %vm352_vm2, %v4709_v51 }
 0x621   :  { %4101 = vmatpush3.msra.mxu0 %v4462_v38  ;;  %4102 = vmatprep.mubr.msk.f32.mxu0 %vm4321_vm1, %v4319_v4  ;;  %v65_v38 = vld [vmem:[%s4892_s7 + $0x88] sm:$0xff]  ;;  %v2909_v53 = vpop.permute.xlu0 %2908 }
 0x622   :  { %4110 = vmatprep.subr.mxu0 %v67_v57 }
 0x624   :  { %4103 = vmatmul.mubr.msk.f32.vlgmr.msra.gmra.mxu0 %vm505_vm3, %v2246_v56 }
 0x625   :  { %4111 = vmatpush3.msra.mxu0 %v67_v57 }
 0x626   :  { %4112 = vmatprep.subr.mxu0 %v66_v18 }
 0x627   :  { %4113 = vmatpush3.msra.mxu0 %v66_v18  ;;  %v71_v18 = vld [vmem:[%s4892_s7 + $0xb8] sm:$0xff] }
 0x628   :  { %4114 = vmatprep.subr.mxu0 %v65_v38 }
 0x629   :  { %4115 = vmatpush3.msra.mxu0 %v65_v38  ;;  %v70_v38 = vld [vmem:[%s4892_s7 + $0xb0] sm:$0xff] }
 0x62a   :  { %4116 = vmatprep.subr.mxu0 %v64_v19 }
 0x62b   :  { %4117 = vmatpush3.msra.mxu0 %v64_v19  ;;  %v69_v19 = vld [vmem:[%s4892_s7 + $0xa8] sm:$0xff] }
 0x62c   :  { %4131 = vmatprep.subr.mxu0 %v4319_v4 }
 0x6ad   :  { %v2390_v51 = vpop.f32.mrf.mxu1 }
 0x6af   :  { %v4109_v54 = vpop.f32.mrf.mxu1 }
 0x6b1   :  { %v2551_v55 = vpop.f32.mrf.mxu1 }
 0x6b2   :  { %v2552_v58 = vadd.f32 %v2551_v55, %v4531_v45 }
 0x6b3   :  { %v4125_v59 = vpop.f32.mrf.mxu1 }
 0x6b4   :  { %v2633_v60 = vsel %vm505_vm3, %v2552_v58, -inf }
 0x6b5   :  { %v2634_v61 = vrot.slane %v2633_v60, 4  ;;  %v2629_v62 = vpop.f32.mrf.mxu1 }
 0x6b6   :  { %v2630_v63 = vadd.f32 %v2629_v62, %v4535_v50 }
 0x6b7   :  { %v2635_v0 = vmax.f32 %v2633_v60, %v2634_v61  ;;  %v4130_v1 = vpop.f32.mrf.mxu1  ;;  %v4803_v60 = vpop.permute.xlu1 %3339 }
 0x6b8   :  { %v2640_v2 = vsel %vm505_vm3, %v2630_v63, -inf }
 0x6b9   :  { %v2636_v3 = vrot.slane %v2635_v0, 2  ;;  %v2641_v5 = vrot.slane %v2640_v2, 4 }
 0x6bb   :  { %v2637_v6 = vmax.f32 %v2635_v0, %v2636_v3  ;;  %v2642_v7 = vmax.f32 %v2640_v2, %v2641_v5  ;;  %v4805_v62 = vpop.permute.xlu1 %3417 }
 0x6bd   :  { %v2638_v8 = vrot.slane %v2637_v6, 1  ;;  %v2643_v9 = vrot.slane %v2642_v7, 2 }
 0x6bf   :  { %v2639_v10 = vmax.f32 %v2637_v6, %v2638_v8  ;;  %v2644_v11 = vmax.f32 %v2642_v7, %v2643_v9  ;;  %v3103_v1 = vpop.permute.xlu1 %3102 }
 0x6c1   :  { %v2647_v12 = vsub.f32 %v2552_v58, %v2639_v10  ;;  %v2645_v13 = vrot.slane %v2644_v11, 1 }
 0x6c3   :  { %v2649_v14 = vmul.f32 1.442695, %v2647_v12  ;;  %v2646_v15 = vmax.f32 %v2644_v11, %v2645_v13 }
 0x6c5   :  { %4273 = vpow2.f32 %v2649_v14  ;;  %v2648_v16 = vsub.f32 %v2630_v63, %v2646_v15 }
 0x6c7   :  { %v2651_v17 = vmul.f32 1.442695, %v2648_v16 }
 0x6c9   :  { %4275 = vpow2.f32 %v2651_v17 }
 0x6d2   :  { %v4274_v20 = vpop.eup %4273 }
 0x6d3   :  { %v2653_v34 = vsel %vm505_vm3, %v4274_v20, 0.0 }
 0x6d4   :  { %v2654_v40 = vrot.slane %v2653_v34, 4 }
 0x6d6   :  { %v4276_v42 = vpop.eup %4275  ;;  %v2655_v21 = vadd.f32 %v2654_v40, %v2653_v34 }
 0x6d7   :  { %v2660_v22 = vsel %vm505_vm3, %v4276_v42, 0.0 }
 0x6d8   :  { %v2656_v23 = vrot.slane %v2655_v21, 2  ;;  %v2661_v24 = vrot.slane %v2660_v22, 4 }
 0x6da   :  { %v2657_v26 = vadd.f32 %v2656_v23, %v2655_v21  ;;  %v2662_v27 = vadd.f32 %v2661_v24, %v2660_v22 }
 0x6dc   :  { %v2658_v41 = vrot.slane %v2657_v26, 1  ;;  %v2663_v43 = vrot.slane %v2662_v27, 2 }
 0x6de   :  { %v2659_v29 = vadd.f32 %v2658_v41, %v2657_v26  ;;  %v2664_v30 = vadd.f32 %v2663_v43, %v2662_v27 }
 0x6e0   :  { %4277 = vrcp.f32 %v2659_v29  ;;  %v2665_v32 = vrot.slane %v2664_v30, 1  ;;  %v4089_v33 = vpop.f32.mrf.mxu0 }
 0x6e1   :  { %v2057_v36 = vadd.f32 %v4089_v33, %v4735_v44 }
 0x6e2   :  { %v2666_v35 = vadd.f32 %v2665_v32, %v2664_v30  ;;  %v2047_v37 = vpop.f32.mrf.mxu0 }
 0x6e3   :  { %v2056_v28 = vadd.f32 %v2047_v37, %v4737_v48  ;;  %v2987_v48 = vpop.permute.xlu0 %2986 }
 0x6e4   :  { %4279 = vrcp.f32 %v2666_v35  ;;  %v2317_v39 = vpop.f32.mrf.mxu0 }
 0x6e5   :  { %4118 = vmatprep.mubr.msk.f32.mxu0 %vm352_vm2, %v2317_v39 }
 0x6e6   :  { %v4104_v47 = vpop.f32.mrf.mxu0  ;;  %4119 = vmatmul.mubr.msk.f32.vlgmr.msra.gmra.mxu0 %vm352_vm2, %v2390_v51  ;;  %v68_v51 = vld [vmem:[%s4892_s7 + $0xa0] sm:$0xff] }
 0x6e7   :  { %4132 = vmatpush3.msra.mxu0 %v2673_v46  ;;  %4133 = vmatprep.mubr.msk.f32.mxu0 %vm4321_vm1, %v4319_v4  ;;  %v3179_v57 = vpop.permute.xlu0 %3178 }
 0x6e8   :  { %4141 = vmatprep.subr.mxu0 %v71_v18 }
 0x6ed   :  { %v4278_v49 = vpop.eup %4277 }
 0x6ee   :  { %v2669_v52 = vmul.f32 %v4278_v49, %v4274_v20 }
 0x6f0   :  { %4134 = vmatmul.mubr.msk.f32.vlgmr.msra.gmra.mxu0 %vm505_vm3, %v2669_v52 }
 0x6f1   :  { %v4280_v44 = vpop.eup %4279  ;;  %4142 = vmatpush3.msra.mxu0 %v71_v18  ;;  %v3338_v18 = vpop.permute.xlu0 %3337 }
 0x6f2   :  { %v2670_v56 = vmul.f32 %v4280_v44, %v4276_v42  ;;  %4143 = vmatprep.subr.mxu0 %v70_v38 }
 0x6f3   :  { %4144 = vmatpush3.msra.mxu0 %v70_v38 }
 0x6f4   :  { %4139 = vmatmul.mubr.msk.f32.vlgmr.msra.gmra.mxu1 %vm505_vm3, %v2670_v56  ;;  %4145 = vmatprep.subr.mxu0 %v69_v19  ;;  %v75_v56 = vld [vmem:[%s4892_s7 + $0xd8] sm:$0xff] }
 0x6f5   :  { %4153 = vmatpush3.xpose.msk.msra.mxu1 %vm352_vm2, %v2911_v25  ;;  %4154 = vmatprep.mubr.msk.f32.mxu1 %vm4321_vm1, %v4319_v4  ;;  %v3416_v38 = vpop.permute.xlu0 %3415 }
 0x6f6   :  { %4157 = vmatprep.subr.mxu1 %v4319_v4  ;;  %4146 = vmatpush3.msra.mxu0 %v69_v19  ;;  %v3608_v19 = vpop.permute.xlu1 %3607 }
 0x6f7   :  { %4147 = vmatprep.subr.mxu0 %v68_v51 }
 0x6f8   :  { %4155 = vmatmul.mubr.msk.f32.vlgmr.msra.gmra.mxu1 %vm352_vm2, %v2909_v53  ;;  %4148 = vmatpush3.msra.mxu0 %v68_v51  ;;  %v73_v51 = vld [vmem:[%s4892_s7 + $0xc8] sm:$0xff] }
 0x6f9   :  { %4158 = vmatpush3.xpose.msk.msra.mxu1 %vm352_vm2, %v2989_v31  ;;  %4159 = vmatprep.mubr.msk.f32.mxu1 %vm4321_vm1, %v4319_v4 }
 0x6fa   :  { %4167 = vmatprep.subr.mxu1 %v4319_v4  ;;  %4162 = vmatprep.subr.mxu0 %v4319_v4 }
 0x6fc   :  { %4160 = vmatmul.mubr.msk.f32.vlgmr.msra.gmra.mxu1 %vm352_vm2, %v2987_v48  ;;  %v74_v48 = vld [vmem:[%s4892_s7 + $0xd0] sm:$0xff] }
 0x6fd   :  { %4168 = vmatpush3.msra.mxu1 %v3179_v57  ;;  %4169 = vmatprep.mubr.msk.f32.mxu1 %vm4321_vm1, %v4319_v4 }
 0x6fe   :  { %4183 = vmatprep.subr.mxu1 %v4319_v4 }
 0x7a6   :  { %v4120_v54 = vpop.f32.mrf.mxu0 }
 0x7a7   :  { %v4799_v55 = vadd.f32 %v4120_v54, %v2057_v36  ;;  %v72_v54 = vld [vmem:[%s4892_s7 + $0xc0] sm:$0xff] }
 0x7a8   :  { %v2466_v58 = vpop.f32.mrf.mxu0 }
 0x7a9   :  { %v4801_v59 = vadd.f32 %v2466_v58, %v2056_v28 }
 0x7b0   :  { %v2744_v61 = vpop.f32.mrf.mxu0 }
 0x7b1   :  { %4149 = vmatprep.mubr.msk.f32.mxu0 %vm352_vm2, %v2744_v61 }
 0x7b2   :  { %v4135_v63 = vpop.f32.mrf.mxu0 }
 0x7b4   :  { %v2821_v0 = vpop.f32.mrf.mxu1 }
 0x7b5   :  { %4150 = vmatmul.mubr.msk.f32.vlgmr.msra.gmra.mxu0 %vm352_vm2, %v2821_v0 }
 0x7b6   :  { %4163 = vmatpush3.msra.mxu0 %v3103_v1  ;;  %v4140_v2 = vpop.f32.mrf.mxu1  ;;  %4164 = vmatprep.mubr.msk.f32.mxu0 %vm4321_vm1, %v4319_v4 }
 0x7b7   :  { %4172 = vmatprep.subr.mxu0 %v75_v56  ;;  %v3532_v2 = vpop.permute.xlu0 %3531 }
 0x7b8   :  { %v2982_v3 = vpop.f32.mrf.mxu1 }
 0x7b9   :  { %v2983_v5 = vadd.f32 %v2982_v3, %v4531_v45 }
 0x7ba   :  { %v4156_v6 = vpop.f32.mrf.mxu1 }
 0x7bb   :  { %v3064_v7 = vsel %vm505_vm3, %v2983_v5, -inf }
 0x7bc   :  { %v3065_v8 = vrot.slane %v3064_v7, 4  ;;  %v3060_v9 = vpop.f32.mrf.mxu1 }
 0x7bd   :  { %v3061_v10 = vadd.f32 %v3060_v9, %v4535_v50 }
 0x7be   :  { %v3066_v11 = vmax.f32 %v3064_v7, %v3065_v8  ;;  %v4161_v12 = vpop.f32.mrf.mxu1 }
 0x7bf   :  { %v3071_v13 = vsel %vm505_vm3, %v3061_v10, -inf }
 0x7c0   :  { %v3067_v14 = vrot.slane %v3066_v11, 2  ;;  %v3072_v15 = vrot.slane %v3071_v13, 4 }
 0x7c2   :  { %v3068_v16 = vmax.f32 %v3066_v11, %v3067_v14  ;;  %v3073_v17 = vmax.f32 %v3071_v13, %v3072_v15 }
 0x7c4   :  { %v3069_v20 = vrot.slane %v3068_v16, 1  ;;  %v3074_v34 = vrot.slane %v3073_v17, 2 }
 0x7c6   :  { %v3070_v40 = vmax.f32 %v3068_v16, %v3069_v20  ;;  %v3075_v42 = vmax.f32 %v3073_v17, %v3074_v34 }
 0x7c8   :  { %v3078_v21 = vsub.f32 %v2983_v5, %v3070_v40  ;;  %v3076_v22 = vrot.slane %v3075_v42, 1 }
 0x7ca   :  { %v3080_v23 = vmul.f32 1.442695, %v3078_v21  ;;  %v3077_v24 = vmax.f32 %v3075_v42, %v3076_v22 }
 0x7cc   :  { %4281 = vpow2.f32 %v3080_v23  ;;  %v3079_v25 = vsub.f32 %v3061_v10, %v3077_v24 }
 0x7ce   :  { %v3082_v26 = vmul.f32 1.442695, %v3079_v25 }
 0x7d0   :  { %4283 = vpow2.f32 %v3082_v26 }
 0x7d9   :  { %v4282_v27 = vpop.eup %4281 }
 0x7da   :  { %v3084_v41 = vsel %vm505_vm3, %v4282_v27, 0.0 }
 0x7db   :  { %v3085_v43 = vrot.slane %v3084_v41, 4 }
 0x7dd   :  { %v4284_v29 = vpop.eup %4283  ;;  %v3086_v30 = vadd.f32 %v3085_v43, %v3084_v41 }
 0x7de   :  { %v3091_v31 = vsel %vm505_vm3, %v4284_v29, 0.0 }
 0x7df   :  { %v3087_v32 = vrot.slane %v3086_v30, 2  ;;  %v3092_v33 = vrot.slane %v3091_v31, 4 }
 0x7e1   :  { %v3088_v36 = vadd.f32 %v3087_v32, %v3086_v30  ;;  %v3093_v35 = vadd.f32 %v3092_v33, %v3091_v31 }
 0x7e3   :  { %v3089_v37 = vrot.slane %v3088_v36, 1  ;;  %v3094_v28 = vrot.slane %v3093_v35, 2 }
 0x7e5   :  { %v3090_v39 = vadd.f32 %v3089_v37, %v3088_v36  ;;  %v3095_v46 = vadd.f32 %v3094_v28, %v3093_v35 }
 0x7e7   :  { %4285 = vrcp.f32 %v3090_v39  ;;  %v3096_v47 = vrot.slane %v3095_v46, 1 }
 0x7e9   :  { %v3097_v49 = vadd.f32 %v3096_v47, %v3095_v46 }
 0x7eb   :  { %4287 = vrcp.f32 %v3097_v49  ;;  %v79_v49 = vld [vmem:[%s4892_s7 + $0xf8] sm:$0xff] }
 0x7f4   :  { %v4286_v52 = vpop.eup %4285 }
 0x7f5   :  { %v3100_v53 = vmul.f32 %v4286_v52, %v4282_v27  ;;  %v78_v52 = vld [vmem:[%s4892_s7 + $0xf0] sm:$0xff] }
 0x7f7   :  { %4165 = vmatmul.mubr.msk.f32.vlgmr.msra.gmra.mxu0 %vm505_vm3, %v3100_v53 }
 0x7f8   :  { %v4288_v44 = vpop.eup %4287  ;;  %4173 = vmatpush3.msra.mxu0 %v75_v56  ;;  %v76_v56 = vld [vmem:[%s4892_s7 + $0xe0] sm:$0xff] }
 0x7f9   :  { %v3101_v57 = vmul.f32 %v4288_v44, %v4284_v29  ;;  %4174 = vmatprep.subr.mxu0 %v74_v48  ;;  %v77_v44 = vld [vmem:[%s4892_s7 + $0xe8] sm:$0xff]  ;;  %s4297_s7 = scalar_lea.vmem %s3774_s25, 256 }
 0x7fa   :  { %4175 = vmatpush3.msra.mxu0 %v74_v48  ;;  %p4298_p0 = scmp.ne.s32.totalorder %s3774_s25, %s4297_s7  ;;  %p4303_p2 = scmp.lt.s32.totalorder %s4297_s7, %s4297_s7 }
 0x7fb   :  { %4170 = vmatmul.mubr.msk.f32.vlgmr.msra.gmra.mxu1 %vm505_vm3, %v3101_v57  ;;  %4176 = vmatprep.subr.mxu0 %v73_v51 }
 0x7fc   :  { %4184 = vmatpush3.xpose.msk.msra.mxu1 %vm352_vm2, %v4803_v60  ;;  %4185 = vmatprep.mubr.msk.f32.mxu1 %vm4321_vm1, %v4319_v4  ;;  %p4304_p3 = por %p4303_p2, %p4302_p1 }
 0x7fd   :  { %4188 = vmatprep.subr.mxu1 %v4319_v4  ;;  %4177 = vmatpush3.msra.mxu0 %v73_v51 }
 0x7fe   :  { %4178 = vmatprep.subr.mxu0 %v72_v54  ;;  %p4305_p4 = pnand %p4304_p3, %p4298_p0 }
 0x7ff   :  { %4186 = vmatmul.mubr.msk.f32.vlgmr.msra.gmra.mxu1 %vm352_vm2, %v3338_v18  ;;  %4179 = vmatpush3.msra.mxu0 %v72_v54 }
 0x800   :  { %4189 = vmatpush3.xpose.msk.msra.mxu1 %vm352_vm2, %v4805_v62  ;;  %4190 = vmatprep.mubr.msk.f32.mxu1 %vm4321_vm1, %v4319_v4 }
 0x801   :  { %4198 = vmatprep.subr.mxu1 %v4319_v4  ;;  %4193 = vmatprep.subr.mxu0 %v4319_v4 }
 0x803   :  { %4191 = vmatmul.mubr.msk.f32.vlgmr.msra.gmra.mxu1 %vm352_vm2, %v3416_v38 }
 0x804   :  { %4199 = vmatpush3.msra.mxu1 %v3608_v19  ;;  %4200 = vmatprep.mubr.msk.f32.mxu1 %vm4321_vm1, %v4319_v4 }
 0x875   :  { %v4151_v58 = vpop.f32.mrf.mxu0 }
 0x876   :  { %v4847_v60 = vadd.f32 %v4151_v58, %v4799_v55 }
 0x877   :  { %v2897_v61 = vpop.f32.mrf.mxu0 }
 0x878   :  { %v4850_v62 = vadd.f32 %v2897_v61, %v4801_v59 }
 0x8b7   :  { %v3174_v63 = vpop.f32.mrf.mxu0 }
 0x8b8   :  { %4180 = vmatprep.mubr.msk.f32.mxu0 %vm352_vm2, %v3174_v63 }
 0x8b9   :  { %v4166_v0 = vpop.f32.mrf.mxu0 }
 0x8bb   :  { %v3250_v1 = vpop.f32.mrf.mxu1 }
 0x8bc   :  { %4181 = vmatmul.mubr.msk.f32.vlgmr.msra.gmra.mxu0 %vm352_vm2, %v3250_v1 }
 0x8bd   :  { %4194 = vmatpush3.msra.mxu0 %v3532_v2  ;;  %v4171_v3 = vpop.f32.mrf.mxu1  ;;  %4195 = vmatprep.mubr.msk.f32.mxu0 %vm4321_vm1, %v4319_v4 }
 0x8be   :  { %4203 = vmatprep.subr.mxu0 %v79_v49 }
 0x8bf   :  { %v3411_v5 = vpop.f32.mrf.mxu1 }
 0x8c0   :  { %v3412_v55 = vadd.f32 %v3411_v5, %v4531_v45 }
 0x8c1   :  { %v4187_v6 = vpop.f32.mrf.mxu1 }
 0x8c2   :  { %v3493_v59 = vsel %vm505_vm3, %v3412_v55, -inf }
 0x8c3   :  { %v3494_v7 = vrot.slane %v3493_v59, 4  ;;  %v3489_v8 = vpop.f32.mrf.mxu1 }
 0x8c4   :  { %v3490_v9 = vadd.f32 %v3489_v8, %v4535_v50 }
 0x8c5   :  { %v3495_v10 = vmax.f32 %v3493_v59, %v3494_v7  ;;  %v4192_v11 = vpop.f32.mrf.mxu1 }
 0x8c6   :  { %v3500_v12 = vsel %vm505_vm3, %v3490_v9, -inf }
 0x8c7   :  { %v3496_v13 = vrot.slane %v3495_v10, 2  ;;  %v3501_v14 = vrot.slane %v3500_v12, 4 }
 0x8c9   :  { %v3497_v15 = vmax.f32 %v3495_v10, %v3496_v13  ;;  %v3502_v16 = vmax.f32 %v3500_v12, %v3501_v14 }
 0x8cb   :  { %v3498_v17 = vrot.slane %v3497_v15, 1  ;;  %v3503_v4 = vrot.slane %v3502_v16, 2 }
 0x8cd   :  { %v3499_v20 = vmax.f32 %v3497_v15, %v3498_v17  ;;  %v3504_v34 = vmax.f32 %v3502_v16, %v3503_v4 }
 0x8cf   :  { %v3507_v45 = vsub.f32 %v3412_v55, %v3499_v20  ;;  %v3505_v40 = vrot.slane %v3504_v34, 1 }
 0x8d1   :  { %v3509_v42 = vmul.f32 1.442695, %v3507_v45  ;;  %v3506_v21 = vmax.f32 %v3504_v34, %v3505_v40 }
 0x8d3   :  { %4289 = vpow2.f32 %v3509_v42  ;;  %v3508_v22 = vsub.f32 %v3490_v9, %v3506_v21 }
 0x8d5   :  { %v3511_v23 = vmul.f32 1.442695, %v3508_v22 }
 0x8d7   :  { %4291 = vpow2.f32 %v3511_v23 }
 0x8e0   :  { %v4290_v50 = vpop.eup %4289 }
 0x8e1   :  { %v3513_v24 = vsel %vm505_vm3, %v4290_v50, 0.0 }
 0x8e2   :  { %v3514_v25 = vrot.slane %v3513_v24, 4 }
 0x8e4   :  { %v4292_v26 = vpop.eup %4291  ;;  %v3515_v27 = vadd.f32 %v3514_v25, %v3513_v24 }
 0x8e5   :  { %v3520_v41 = vsel %vm505_vm3, %v4292_v26, 0.0 }
 0x8e6   :  { %v3516_v43 = vrot.slane %v3515_v27, 2  ;;  %v3521_v29 = vrot.slane %v3520_v41, 4 }
 0x8e8   :  { %v3517_v30 = vadd.f32 %v3516_v43, %v3515_v27  ;;  %v3522_v31 = vadd.f32 %v3521_v29, %v3520_v41 }
 0x8ea   :  { %v3518_v32 = vrot.slane %v3517_v30, 1  ;;  %v3523_v33 = vrot.slane %v3522_v31, 2 }
 0x8ec   :  { %v3519_v36 = vadd.f32 %v3518_v32, %v3517_v30  ;;  %v3524_v35 = vadd.f32 %v3523_v33, %v3522_v31 }
 0x8ee   :  { %4293 = vrcp.f32 %v3519_v36  ;;  %v3525_v37 = vrot.slane %v3524_v35, 1 }
 0x8f0   :  { %v3526_v28 = vadd.f32 %v3525_v37, %v3524_v35 }
 0x8f2   :  { %4295 = vrcp.f32 %v3526_v28 }
 0x8fb   :  { %v4294_v39 = vpop.eup %4293 }
 0x8fc   :  { %v3529_v46 = vmul.f32 %v4294_v39, %v4290_v50 }
 0x8fe   :  { %4196 = vmatmul.mubr.msk.f32.vlgmr.msra.gmra.mxu0 %vm505_vm3, %v3529_v46 }
 0x8ff   :  { %v4296_v47 = vpop.eup %4295  ;;  %4204 = vmatpush3.msra.mxu0 %v79_v49 }
 0x900   :  { %v3530_v53 = vmul.f32 %v4296_v47, %v4292_v26  ;;  %4205 = vmatprep.subr.mxu0 %v78_v52 }
 0x901   :  { %4206 = vmatpush3.msra.mxu0 %v78_v52 }
 0x902   :  { %4201 = vmatmul.mubr.msk.f32.vlgmr.msra.gmra.mxu1 %vm505_vm3, %v3530_v53  ;;  %4207 = vmatprep.subr.mxu0 %v77_v44 }
 0x903   :  { %4208 = vmatpush3.msra.mxu0 %v77_v44 }
 0x904   :  { %4209 = vmatprep.subr.mxu0 %v76_v56 }
 0x905   :  { %4210 = vmatpush3.msra.mxu0 %v76_v56 }
 0x97c   :  { %v4182_v48 = vpop.f32.mrf.mxu0 }
 0x97d   :  { %v3336_v57 = vadd.f32 %v4182_v48, %v4847_v60 }
 0x97e   :  { %v3326_v18 = vpop.f32.mrf.mxu0 }
 0x97f   :  { %v3335_v38 = vadd.f32 %v3326_v18, %v4850_v62 }
 0x9be   :  { %v3603_v19 = vpop.f32.mrf.mxu0 }
 0x9bf   :  { %4211 = vmatprep.mubr.msk.f32.mxu0 %vm352_vm2, %v3603_v19 }
 0x9c0   :  { %v4197_v51 = vpop.f32.mrf.mxu0 }
 0x9c2   :  { %v3679_v54 = vpop.f32.mrf.mxu1 }
 0x9c3   :  { %4212 = vmatmul.mubr.msk.f32.vlgmr.msra.gmra.mxu0 %vm352_vm2, %v3679_v54 }
 0x9c4   :  { %v4202_v58 = vpop.f32.mrf.mxu1 }
 0xa83   :  { %v4213_v61 = vpop.f32.mrf.mxu0 }
 0xa84   :  { %v3765_v63 = vadd.f32 %v4213_v61, %v3336_v57 }
 0xa85   :  { %v3755_v0 = vpop.f32.mrf.mxu0 }
 0xa86   :  { %3767 = vst.msk [vmem:[#allocation2 + $0x8] sm:$0xff] %vm352_vm2, %v3765_v63  ;;  %v3764_v1 = vadd.f32 %v3755_v0, %v3335_v38 }
 0xa88   :  { %3766 = vst.msk [vmem:[#allocation2] sm:$0xff] %vm352_vm2, %v3764_v1 }
 0xa89   :  { %4308 = shalt.err (!%p4305_p4)
}
 0xa8a   :  { %s4326_s26 = smov 128   ;;  %s4327_s27 = smov 8  }
 0xa8b   :  { %3779 = dma.vmem_to_hbm [thread:$0]  %s3774_s25, 256, %s4893_s8, [#allocation3], %s4326_s26, %s4326_s26, %s4327_s27  }
 0xa8c   :  { %4317 = dma.done.wait [#allocation3], 256  }
 0xa8d   :  { %4318 = vsyncadd [#allocation3], 4294967040 }
 0xa8e   :  { %3783 = vsyncpa [#allocation3], 1 }

</bundles_post_ra>
